<compile_context>
chip_gen: v7x
topology: tpu7x:2x2x1
jax: 0.10.0
libtpu: 0.0.40
codegen_flags: <defaults>
</compile_context>

<pallas_src>
import functools

import jax
import jax.numpy as jnp
from jax.experimental import pallas as pl
from jax.experimental.pallas import tpu as pltpu


# ---------------------------------------------------------------------------
# In-kernel / glue helpers
# ---------------------------------------------------------------------------
def _layernorm(x, gamma, beta, eps=1e-12):
    mean = jnp.mean(x, axis=-1, keepdims=True)
    var = jnp.mean((x - mean) ** 2, axis=-1, keepdims=True)
    return (x - mean) * jax.lax.rsqrt(var + eps) * gamma + beta


# ---------------------------------------------------------------------------
# Fused kernel: one encoder layer per grid step (weights streamed), classifier fused at the end
# ---------------------------------------------------------------------------
def encoder_classifier_kernel(nh,
                              x_ref, am_ref, dm_ref,
                              wqkv_ref, bqkv_ref, wo_ref, bo_ref,
                              ln1g_ref, ln1b_ref,
                              wf1_ref, bf1_ref, wf2_ref, bf2_ref,
                              ln2g_ref, ln2b_ref,
                              wt_ref, bt_ref, wb_ref, bb_ref,
                              out_ref,
                              h_scr):
    l = pl.program_id(1)
    n_layers = pl.num_programs(1)
    Bt, S, H = h_scr.shape
    hd = H // nh
    scale = 1.0 / float(hd) ** 0.5

    # Layer 0: load the embedding block into the VMEM hidden-state carry.
    @pl.when(l == 0)
    def _():
        h_scr[...] = x_ref[...].astype(jnp.float32)

    hid = h_scr[...]                                   # (Bt, S, H) f32 carry
    hid2 = hid.reshape(Bt * S, H)                      # flatten batch tile for MXU M-fill

    # Fused QKV projection: one bf16 MXU matmul on the streamed layer-l weight.
    qkv = (jnp.dot(hid2.astype(jnp.bfloat16), wqkv_ref[0],
                   preferred_element_type=jnp.float32) + bqkv_ref[0])     # (Bt*S, 3H)
    qkv = qkv.reshape(Bt, S, 3 * H)

    # Head-major (Bt*nh, S, hd) layout via static lane slices; 1/sqrt(hd) folded into q here
    # instead of scaling the (nh, S, S) score slab.
    # TODO(synk): replace the per-head slice/stack/concat with a single reshape +
    # pltpu.einshape relayout once the split-lane reshape is validated for this shape.
    q = jnp.stack([qkv[:, :, i * hd:(i + 1) * hd] for i in range(nh)], axis=1) * scale
    k = jnp.stack([qkv[:, :, H + i * hd:H + (i + 1) * hd] for i in range(nh)], axis=1)
    v = jnp.stack([qkv[:, :, 2 * H + i * hd:2 * H + (i + 1) * hd] for i in range(nh)], axis=1)
    q = q.reshape(Bt * nh, S, hd).astype(jnp.bfloat16)
    k = k.reshape(Bt * nh, S, hd).astype(jnp.bfloat16)
    v = v.reshape(Bt * nh, S, hd).astype(jnp.bfloat16)

    # Batched-head attention: (Bt*nh) is a single leading batch dim.
    # TODO(synk): at production S, switch to a flash-style (q-tile, kv-tile) inner pipeline with
    # online softmax so the (Bt*nh, S, S) score slab is never fully materialized.
    s = jnp.einsum('bqd,bkd->bqk', q, k, preferred_element_type=jnp.float32)
    s = s + am_ref[...]                                # (Bt*nh, 1, S) additive padding mask
    s = s - jnp.max(s, axis=-1, keepdims=True)
    e = jnp.exp(s)
    p = e * pl.reciprocal(jnp.sum(e, axis=-1, keepdims=True), approx=True)
    # TODO(synk): BERT attention-probs dropout omitted (eval-mode identity).
    ctx = jnp.einsum('bqk,bkd->bqd', p.astype(jnp.bfloat16), v,
                     preferred_element_type=jnp.float32)                  # (Bt*nh, S, hd)
    ctx = ctx.reshape(Bt, nh, S, hd)
    ctx = jnp.concatenate([ctx[:, i] for i in range(nh)], axis=-1)        # (Bt, S, H)
    ctx = ctx.reshape(Bt * S, H).astype(jnp.bfloat16)

    attn = jnp.dot(ctx, wo_ref[0], preferred_element_type=jnp.float32) + bo_ref[0]
    h1 = _layernorm(hid2 + attn, ln1g_ref[0], ln1b_ref[0])

    ff = (jnp.dot(h1.astype(jnp.bfloat16), wf1_ref[0],
                  preferred_element_type=jnp.float32) + bf1_ref[0])
    # TODO(synk): HF BERT uses erf-based GELU; tanh approximation used here.
    ff = jax.nn.gelu(ff, approximate=True)
    ff = (jnp.dot(ff.astype(jnp.bfloat16), wf2_ref[0],
                  preferred_element_type=jnp.float32) + bf2_ref[0])
    h2 = _layernorm(h1 + ff, ln2g_ref[0], ln2b_ref[0])

    h_scr[...] = h2.reshape(Bt, S, H)

    # Last layer: CLS row -> dropout mask -> Linear -> ReLU -> Linear, emit logits only.
    @pl.when(l == n_layers - 1)
    def _():
        cls = h_scr[:, 0, :] * dm_ref[...]                                # (Bt, H)
        mid = (jnp.dot(cls.astype(jnp.bfloat16), wt_ref[...],
                       preferred_element_type=jnp.float32) + bt_ref[...])
        mid = jnp.maximum(mid, 0.0)                                       # ReLU
        out_ref[...] = (jnp.dot(mid.astype(jnp.bfloat16), wb_ref[...],
                                preferred_element_type=jnp.float32) + bb_ref[...])


def run_intent_kernel(x_bf16, amask_h, drop_mask, enc, clf, num_heads,
                      batch_tile=2, vmem_limit_bytes=48 * 1024 * 1024):
    # vmem_limit_bytes is a per-generation knob: v5e/v6e (128 MiB physical) can raise toward
    # ~100 MiB for deeper buffering / bigger batch tiles; v7x (64 MiB per TC) keep <= ~56 MiB.
    B, S, H = x_bf16.shape
    Bt = min(batch_tile, B)
    assert B % Bt == 0
    L = enc['wqkv'].shape[0]
    T_pad = clf['w_bot'].shape[1]

    enc_w = (enc['wqkv'], enc['bqkv'], enc['wo'], enc['bo'],
             enc['ln1g'], enc['ln1b'], enc['wf1'], enc['bf1'],
             enc['wf2'], enc['bf2'], enc['ln2g'], enc['ln2b'])
    clf_w = (clf['w_top'], clf['b_top'], clf['w_bot'], clf['b_bot'])

    def stream(w):   # per-layer weight block, streamed along the innermost L grid axis
        return pl.BlockSpec((1,) + w.shape[1:], lambda b, l: (l,) + (0,) * (w.ndim - 1))

    def resident(w):  # grid-invariant classifier block (DMA'd once, stays in VMEM)
        # TODO(synk): mark these pipeline_mode=pl.Buffered(1) to drop the redundant second
        # buffer on v7x's 64 MiB VMEM.
        return pl.BlockSpec(w.shape, lambda b, l: (0,) * w.ndim)

    in_specs = ([pl.BlockSpec((Bt, S, H), lambda b, l: (b, 0, 0)),              # embeddings
                 pl.BlockSpec((Bt * num_heads, 1, S), lambda b, l: (b, 0, 0)),  # per-head mask
                 pl.BlockSpec((Bt, H), lambda b, l: (b, 0))]                    # dropout mask
                + [stream(w) for w in enc_w]
                + [resident(w) for w in clf_w])

    return pl.pallas_call(
        functools.partial(encoder_classifier_kernel, num_heads),
        out_shape=jax.ShapeDtypeStruct((B, T_pad), jnp.float32),
        grid=(B // Bt, L),
        in_specs=in_specs,
        out_specs=pl.BlockSpec((Bt, T_pad), lambda b, l: (b, 0)),
        scratch_shapes=[pltpu.VMEM((Bt, S, H), jnp.float32)],   # hidden-state carry across L
        compiler_params=pltpu.CompilerParams(
            dimension_semantics=("parallel", "arbitrary"),
            vmem_limit_bytes=vmem_limit_bytes),
    )(x_bf16, amask_h, drop_mask, *enc_w, *clf_w)


# ---------------------------------------------------------------------------
# Full IntentModel forward (embedding gather in JAX, encoder+classifier in one Pallas kernel)
# ---------------------------------------------------------------------------
def intent_model_forward(params, inputs, drop_mask, cfg):
    input_ids = inputs['input_ids']            # (B, S) int32
    token_type_ids = inputs['token_type_ids']  # (B, S) int32
    attention_mask = inputs['attention_mask']  # (B, S) int32
    B, S = input_ids.shape
    nh = cfg['num_heads']

    # --- embeddings (gather = glue, stays in JAX) ---
    emb = (params['word_emb'][input_ids]
           + params['pos_emb'][jnp.arange(S)][None, :, :]
           + params['type_emb'][token_type_ids])
    emb = _layernorm(emb, params['emb_ln_g'], params['emb_ln_b'])
    # TODO(synk): BERT embedding dropout omitted (eval-mode identity).

    # additive attention mask, pre-expanded per head: (B*nh, 1, S), 0 keep / -1e4 pad
    amask = (1.0 - attention_mask.astype(jnp.float32)) * -1e4              # (B, S)
    amask_h = jnp.broadcast_to(amask[:, None, :], (B, nh, S)).reshape(B * nh, 1, S)

    logits_pad = run_intent_kernel(emb.astype(jnp.bfloat16), amask_h, drop_mask,
                                   params['encoder'], params['classifier'], nh,
                                   batch_tile=cfg.get('batch_tile', 2))
    return logits_pad[:, :cfg['target_size']]   # slice off lane padding


# ---------------------------------------------------------------------------
# Deterministic parameter construction (weights bf16, biases/LN f32, layers stacked on L)
# ---------------------------------------------------------------------------
def init_params(key, cfg):
    H, F = cfg['embed_dim'], cfg['ffn_dim']
    Hd, T = cfg['hidden_dim'], cfg['target_size']
    L = cfg['num_layers']
    T_pad = ((T + 127) // 128) * 128           # lane-dense classifier output

    def nrm(k, shape, scale=0.02, dtype=jnp.float32):
        return (scale * jax.random.normal(k, shape, dtype=jnp.float32)).astype(dtype)

    keys = iter(jax.random.split(key, 16))
    bf = jnp.bfloat16
    params = {
        'word_emb': nrm(next(keys), (cfg['vocab_size'], H)),
        'pos_emb': nrm(next(keys), (cfg['max_pos'], H)),
        'type_emb': nrm(next(keys), (2, H)),
        'emb_ln_g': jnp.ones((H,), jnp.float32),
        'emb_ln_b': jnp.zeros((H,), jnp.float32),
        'encoder': {
            'wqkv': nrm(next(keys), (L, H, 3 * H), dtype=bf),
            'bqkv': jnp.zeros((L, 1, 3 * H), jnp.float32),
            'wo':   nrm(next(keys), (L, H, H), dtype=bf),
            'bo':   jnp.zeros((L, 1, H), jnp.float32),
            'ln1g': jnp.ones((L, 1, H), jnp.float32),
            'ln1b': jnp.zeros((L, 1, H), jnp.float32),
            'wf1':  nrm(next(keys), (L, H, F), dtype=bf),
            'bf1':  jnp.zeros((L, 1, F), jnp.float32),
            'wf2':  nrm(next(keys), (L, F, H), dtype=bf),
            'bf2':  jnp.zeros((L, 1, H), jnp.float32),
            'ln2g': jnp.ones((L, 1, H), jnp.float32),
            'ln2b': jnp.zeros((L, 1, H), jnp.float32),
        },
    }
    w_bot = jnp.zeros((Hd, T_pad), jnp.float32).at[:, :T].set(
        0.02 * jax.random.normal(next(keys), (Hd, T), dtype=jnp.float32))
    params['classifier'] = {
        'w_top': nrm(next(keys), (H, Hd), dtype=bf),
        'b_top': jnp.zeros((1, Hd), jnp.float32),
        'w_bot': w_bot.astype(bf),                      # padded columns are exactly zero
        'b_bot': jnp.zeros((1, T_pad), jnp.float32),
    }
    return params


if __name__ == "__main__":
    # Small, lane-dense test config (H, F, hidden_dim multiples of 128; head_dim = 64).
    cfg = dict(vocab_size=30, max_pos=16, embed_dim=128, num_heads=2, ffn_dim=512,
               num_layers=2, hidden_dim=128, target_size=5, drop_rate=0.1,
               batch=2, seq=8, batch_tile=2)

    key = jax.random.PRNGKey(0)
    k_param, k_ids, k_drop = jax.random.split(key, 3)

    params = init_params(k_param, cfg)

    B, S = cfg['batch'], cfg['seq']
    input_ids = jax.random.randint(k_ids, (B, S), 0, cfg['vocab_size'], dtype=jnp.int32)
    token_type_ids = jnp.zeros((B, S), dtype=jnp.int32)
    # example 1 has two padded positions at the end
    attention_mask = jnp.array([[1] * S, [1] * (S - 2) + [0, 0]], dtype=jnp.int32)
    inputs = dict(input_ids=input_ids, token_type_ids=token_type_ids,
                  attention_mask=attention_mask)

    # training-mode dropout keep-mask (deterministic), pre-scaled by 1/(1-p)
    p_drop = cfg['drop_rate']
    keep = jax.random.bernoulli(k_drop, 1.0 - p_drop, (B, cfg['embed_dim']))
    drop_mask = keep.astype(jnp.float32) / (1.0 - p_drop)

    logits = intent_model_forward(params, inputs, drop_mask, cfg)
    logits = jax.block_until_ready(logits)

    assert logits.shape == (B, cfg['target_size'])
    assert bool(jnp.all(jnp.isfinite(logits)))
    print("KERNEL_OK")
</pallas_src>

<mosaic_0001>
module attributes {stable_mosaic.version = 11 : i64} {
  func.func @encoder_classifier_kernel(%arg0: i32, %arg1: i32, %arg2: memref<2x8x128xbf16, #tpu.memory_space<vmem>>, %arg3: memref<4x1x8xf32, #tpu.memory_space<vmem>>, %arg4: memref<2x128xf32, #tpu.memory_space<vmem>>, %arg5: memref<1x128x384xbf16, #tpu.memory_space<vmem>>, %arg6: memref<1x1x384xf32, #tpu.memory_space<vmem>>, %arg7: memref<1x128x128xbf16, #tpu.memory_space<vmem>>, %arg8: memref<1x1x128xf32, #tpu.memory_space<vmem>>, %arg9: memref<1x1x128xf32, #tpu.memory_space<vmem>>, %arg10: memref<1x1x128xf32, #tpu.memory_space<vmem>>, %arg11: memref<1x128x512xbf16, #tpu.memory_space<vmem>>, %arg12: memref<1x1x512xf32, #tpu.memory_space<vmem>>, %arg13: memref<1x512x128xbf16, #tpu.memory_space<vmem>>, %arg14: memref<1x1x128xf32, #tpu.memory_space<vmem>>, %arg15: memref<1x1x128xf32, #tpu.memory_space<vmem>>, %arg16: memref<1x1x128xf32, #tpu.memory_space<vmem>>, %arg17: memref<128x128xbf16, #tpu.memory_space<vmem>>, %arg18: memref<1x128xf32, #tpu.memory_space<vmem>>, %arg19: memref<128x128xbf16, #tpu.memory_space<vmem>>, %arg20: memref<1x128xf32, #tpu.memory_space<vmem>>, %arg21: memref<2x128xf32, #tpu.memory_space<vmem>>, %arg22: memref<2x8x128xf32, #tpu.memory_space<vmem>>) attributes {dimension_semantics = [#tpu.dimension_semantics<parallel>, #tpu.dimension_semantics<arbitrary>], iteration_bounds = array<i64: 1, 2>, scalar_prefetch = 0 : i64, scratch_operands = 1 : i64, tpu.core_type = #tpu.core_type<tc>, window_params = [{transform_indices = @transform_0, window_bounds = array<i64: 2, 8, 128>}, {transform_indices = @transform_1, window_bounds = array<i64: 4, 1, 8>}, {transform_indices = @transform_2, window_bounds = array<i64: 2, 128>}, {transform_indices = @transform_3, window_bounds = array<i64: 1, 128, 384>}, {transform_indices = @transform_4, window_bounds = array<i64: 1, 1, 384>}, {transform_indices = @transform_5, window_bounds = array<i64: 1, 128, 128>}, {transform_indices = @transform_6, window_bounds = array<i64: 1, 1, 128>}, {transform_indices = @transform_7, window_bounds = array<i64: 1, 1, 128>}, {transform_indices = @transform_8, window_bounds = array<i64: 1, 1, 128>}, {transform_indices = @transform_9, window_bounds = array<i64: 1, 128, 512>}, {transform_indices = @transform_10, window_bounds = array<i64: 1, 1, 512>}, {transform_indices = @transform_11, window_bounds = array<i64: 1, 512, 128>}, {transform_indices = @transform_12, window_bounds = array<i64: 1, 1, 128>}, {transform_indices = @transform_13, window_bounds = array<i64: 1, 1, 128>}, {transform_indices = @transform_14, window_bounds = array<i64: 1, 1, 128>}, {pipeline_mode = #tpu.pipeline_mode<synchronous>, transform_indices = @transform_15, window_bounds = array<i64: 128, 128>}, {pipeline_mode = #tpu.pipeline_mode<synchronous>, transform_indices = @transform_16, window_bounds = array<i64: 1, 128>}, {pipeline_mode = #tpu.pipeline_mode<synchronous>, transform_indices = @transform_17, window_bounds = array<i64: 128, 128>}, {pipeline_mode = #tpu.pipeline_mode<synchronous>, transform_indices = @transform_18, window_bounds = array<i64: 1, 128>}, {transform_indices = @transform_19, window_bounds = array<i64: 2, 128>}]} {
    %c0_i32 = arith.constant 0 : i32
    %0 = arith.cmpi eq, %arg1, %c0_i32 : i32
    %1 = arith.extui %0 : i1 to i32
    %c0_i32_0 = arith.constant 0 : i32
    %2 = arith.cmpi ne, %1, %c0_i32_0 : i32
    scf.if %2 {
      %c0_68 = arith.constant 0 : index
      %c0_69 = arith.constant 0 : index
      %c0_70 = arith.constant 0 : index
      %156 = vector.load %arg2[%c0_68, %c0_69, %c0_70] : memref<2x8x128xbf16, #tpu.memory_space<vmem>>, vector<2x8x128xbf16>
      %157 = arith.extf %156 : vector<2x8x128xbf16> to vector<2x8x128xf32>
      %c0_71 = arith.constant 0 : index
      %c0_72 = arith.constant 0 : index
      %c0_73 = arith.constant 0 : index
      %158 = vector.load %arg22[%c0_71, %c0_72, %c0_73] : memref<2x8x128xf32, #tpu.memory_space<vmem>>, vector<2x8x128xf32>
      tpu.vector_store %arg22[%c0_71, %c0_72, %c0_73], %157 {strides = array<i32>} : memref<2x8x128xf32, #tpu.memory_space<vmem>>, vector<2x8x128xf32>,
    } else {
    }
    %c0 = arith.constant 0 : index
    %c0_1 = arith.constant 0 : index
    %c0_2 = arith.constant 0 : index
    %3 = vector.load %arg22[%c0, %c0_1, %c0_2] : memref<2x8x128xf32, #tpu.memory_space<vmem>>, vector<2x8x128xf32>
    %4 = vector.shape_cast %3 : vector<2x8x128xf32> to vector<16x128xf32>
    %5 = arith.truncf %4 : vector<16x128xf32> to vector<16x128xbf16>
    %c0_3 = arith.constant 0 : index
    %c0_4 = arith.constant 0 : index
    %c0_5 = arith.constant 0 : index
    %6 = vector.load %arg5[%c0_3, %c0_4, %c0_5] : memref<1x128x384xbf16, #tpu.memory_space<vmem>>, vector<1x128x384xbf16>
    %7 = vector.shape_cast %6 : vector<1x128x384xbf16> to vector<128x384xbf16>
    %cst = arith.constant dense<0.000000e+00> : vector<16x384xf32>
    %8 = tpu.matmul %5, %7, %cst {dimension_numbers = #tpu.dot_dimension_numbers<[1], [0], [0], [1], [0, 0, 1, 1], [], []>} : vector<16x128xbf16>, vector<128x384xbf16>, vector<16x384xf32> -> vector<16x384xf32>
    %c0_6 = arith.constant 0 : index
    %c0_7 = arith.constant 0 : index
    %c0_8 = arith.constant 0 : index
    %9 = vector.load %arg6[%c0_6, %c0_7, %c0_8] : memref<1x1x384xf32, #tpu.memory_space<vmem>>, vector<1x1x384xf32>
    %10 = vector.shape_cast %9 : vector<1x1x384xf32> to vector<1x384xf32>
    %11 = vector.broadcast %10 : vector<1x384xf32> to vector<16x384xf32>
    %12 = arith.addf %8, %11 : vector<16x384xf32>
    %13 = vector.shape_cast %12 : vector<16x384xf32> to vector<2x8x384xf32>
    %14 = vector.extract_strided_slice %13 {offsets = [0, 0, 0], sizes = [2, 8, 64], strides = [1, 1, 1]} : vector<2x8x384xf32> to vector<2x8x64xf32>
    %15 = vector.extract_strided_slice %13 {offsets = [0, 0, 64], sizes = [2, 8, 64], strides = [1, 1, 1]} : vector<2x8x384xf32> to vector<2x8x64xf32>
    %16 = vector.shape_cast %14 : vector<2x8x64xf32> to vector<2x1x8x64xf32>
    %17 = vector.shape_cast %15 : vector<2x8x64xf32> to vector<2x1x8x64xf32>
    %18 = tpu.concatenate %16, %17 in 1 : vector<2x1x8x64xf32>, vector<2x1x8x64xf32> -> vector<2x2x8x64xf32>
    %cst_9 = arith.constant 1.250000e-01 : f32
    %19 = vector.broadcast %cst_9 : f32 to vector<2x2x8x64xf32>
    %20 = arith.mulf %18, %19 : vector<2x2x8x64xf32>
    %21 = vector.extract_strided_slice %13 {offsets = [0, 0, 128], sizes = [2, 8, 64], strides = [1, 1, 1]} : vector<2x8x384xf32> to vector<2x8x64xf32>
    %22 = vector.extract_strided_slice %13 {offsets = [0, 0, 192], sizes = [2, 8, 64], strides = [1, 1, 1]} : vector<2x8x384xf32> to vector<2x8x64xf32>
    %23 = vector.shape_cast %21 : vector<2x8x64xf32> to vector<2x1x8x64xf32>
    %24 = vector.shape_cast %22 : vector<2x8x64xf32> to vector<2x1x8x64xf32>
    %25 = tpu.concatenate %23, %24 in 1 : vector<2x1x8x64xf32>, vector<2x1x8x64xf32> -> vector<2x2x8x64xf32>
    %26 = vector.extract_strided_slice %13 {offsets = [0, 0, 256], sizes = [2, 8, 64], strides = [1, 1, 1]} : vector<2x8x384xf32> to vector<2x8x64xf32>
    %27 = vector.extract_strided_slice %13 {offsets = [0, 0, 320], sizes = [2, 8, 64], strides = [1, 1, 1]} : vector<2x8x384xf32> to vector<2x8x64xf32>
    %28 = vector.shape_cast %26 : vector<2x8x64xf32> to vector<2x1x8x64xf32>
    %29 = vector.shape_cast %27 : vector<2x8x64xf32> to vector<2x1x8x64xf32>
    %30 = tpu.concatenate %28, %29 in 1 : vector<2x1x8x64xf32>, vector<2x1x8x64xf32> -> vector<2x2x8x64xf32>
    %31 = vector.shape_cast %20 : vector<2x2x8x64xf32> to vector<4x8x64xf32>
    %32 = arith.truncf %31 : vector<4x8x64xf32> to vector<4x8x64xbf16>
    %33 = vector.shape_cast %25 : vector<2x2x8x64xf32> to vector<4x8x64xf32>
    %34 = arith.truncf %33 : vector<4x8x64xf32> to vector<4x8x64xbf16>
    %35 = vector.shape_cast %30 : vector<2x2x8x64xf32> to vector<4x8x64xf32>
    %36 = arith.truncf %35 : vector<4x8x64xf32> to vector<4x8x64xbf16>
    "tpu.trace_start"() <{level = 10 : i32, message = "bqd,bkd->bqk"}> : () -> ()
    %cst_10 = arith.constant dense<0.000000e+00> : vector<4x8x8xf32>
    %37 = tpu.matmul %32, %34, %cst_10 {dimension_numbers = #tpu.dot_dimension_numbers<[2], [2], [1], [1], [0, 0, 0, 1, 1, 1], [0], [0]>} : vector<4x8x64xbf16>, vector<4x8x64xbf16>, vector<4x8x8xf32> -> vector<4x8x8xf32>
    "tpu.trace_stop"() : () -> ()
    %c0_11 = arith.constant 0 : index
    %c0_12 = arith.constant 0 : index
    %c0_13 = arith.constant 0 : index
    %38 = vector.load %arg3[%c0_11, %c0_12, %c0_13] : memref<4x1x8xf32, #tpu.memory_space<vmem>>, vector<4x1x8xf32>
    %39 = vector.broadcast %38 : vector<4x1x8xf32> to vector<4x8x8xf32>
    %40 = arith.addf %37, %39 : vector<4x8x8xf32>
    %cst_14 = arith.constant dense<0xFF800000> : vector<4x8xf32>
    %41 = vector.multi_reduction <maximumf>, %40, %cst_14 [2] : vector<4x8x8xf32> to vector<4x8xf32>
    %42 = vector.shape_cast %41 : vector<4x8xf32> to vector<4x8x1xf32>
    %43 = vector.broadcast %42 : vector<4x8x1xf32> to vector<4x8x8xf32>
    %44 = arith.subf %40, %43 : vector<4x8x8xf32>
    %45 = math.exp %44 : vector<4x8x8xf32>
    %cst_15 = arith.constant dense<0.000000e+00> : vector<4x8xf32>
    %46 = vector.multi_reduction <add>, %45, %cst_15 [2] : vector<4x8x8xf32> to vector<4x8xf32>
    %47 = vector.shape_cast %46 : vector<4x8xf32> to vector<4x8x1xf32>
    %48 = tpu.reciprocal %47 {approx = true} : vector<4x8x1xf32> -> vector<4x8x1xf32>
    %49 = vector.broadcast %48 : vector<4x8x1xf32> to vector<4x8x8xf32>
    %50 = arith.mulf %45, %49 : vector<4x8x8xf32>
    %51 = arith.truncf %50 : vector<4x8x8xf32> to vector<4x8x8xbf16>
    "tpu.trace_start"() <{level = 10 : i32, message = "bqk,bkd->bqd"}> : () -> ()
    %cst_16 = arith.constant dense<0.000000e+00> : vector<4x8x64xf32>
    %52 = tpu.matmul %51, %36, %cst_16 {dimension_numbers = #tpu.dot_dimension_numbers<[2], [1], [1], [2], [0, 0, 0, 1, 1, 2], [0], [0]>} : vector<4x8x8xbf16>, vector<4x8x64xbf16>, vector<4x8x64xf32> -> vector<4x8x64xf32>
    "tpu.trace_stop"() : () -> ()
    %53 = vector.shape_cast %52 : vector<4x8x64xf32> to vector<2x2x8x64xf32>
    %54 = vector.extract_strided_slice %53 {offsets = [0, 0, 0, 0], sizes = [2, 1, 8, 64], strides = [1, 1, 1, 1]} : vector<2x2x8x64xf32> to vector<2x1x8x64xf32>
    %55 = vector.shape_cast %54 : vector<2x1x8x64xf32> to vector<2x8x64xf32>
    %56 = vector.extract_strided_slice %53 {offsets = [0, 1, 0, 0], sizes = [2, 1, 8, 64], strides = [1, 1, 1, 1]} : vector<2x2x8x64xf32> to vector<2x1x8x64xf32>
    %57 = vector.shape_cast %56 : vector<2x1x8x64xf32> to vector<2x8x64xf32>
    %58 = tpu.concatenate %55, %57 in 2 : vector<2x8x64xf32>, vector<2x8x64xf32> -> vector<2x8x128xf32>
    %59 = vector.shape_cast %58 : vector<2x8x128xf32> to vector<16x128xf32>
    %60 = arith.truncf %59 : vector<16x128xf32> to vector<16x128xbf16>
    %c0_17 = arith.constant 0 : index
    %c0_18 = arith.constant 0 : index
    %c0_19 = arith.constant 0 : index
    %61 = vector.load %arg7[%c0_17, %c0_18, %c0_19] : memref<1x128x128xbf16, #tpu.memory_space<vmem>>, vector<1x128x128xbf16>
    %62 = vector.shape_cast %61 : vector<1x128x128xbf16> to vector<128x128xbf16>
    %cst_20 = arith.constant dense<0.000000e+00> : vector<16x128xf32>
    %63 = tpu.matmul %60, %62, %cst_20 {dimension_numbers = #tpu.dot_dimension_numbers<[1], [0], [0], [1], [0, 0, 1, 1], [], []>} : vector<16x128xbf16>, vector<128x128xbf16>, vector<16x128xf32> -> vector<16x128xf32>
    %c0_21 = arith.constant 0 : index
    %c0_22 = arith.constant 0 : index
    %c0_23 = arith.constant 0 : index
    %64 = vector.load %arg8[%c0_21, %c0_22, %c0_23] : memref<1x1x128xf32, #tpu.memory_space<vmem>>, vector<1x1x128xf32>
    %65 = vector.shape_cast %64 : vector<1x1x128xf32> to vector<1x128xf32>
    %66 = vector.broadcast %65 : vector<1x128xf32> to vector<16x128xf32>
    %67 = arith.addf %63, %66 : vector<16x128xf32>
    %68 = arith.addf %4, %67 : vector<16x128xf32>
    %c0_24 = arith.constant 0 : index
    %c0_25 = arith.constant 0 : index
    %c0_26 = arith.constant 0 : index
    %69 = vector.load %arg9[%c0_24, %c0_25, %c0_26] : memref<1x1x128xf32, #tpu.memory_space<vmem>>, vector<1x1x128xf32>
    %70 = vector.shape_cast %69 : vector<1x1x128xf32> to vector<1x128xf32>
    %c0_27 = arith.constant 0 : index
    %c0_28 = arith.constant 0 : index
    %c0_29 = arith.constant 0 : index
    %71 = vector.load %arg10[%c0_27, %c0_28, %c0_29] : memref<1x1x128xf32, #tpu.memory_space<vmem>>, vector<1x1x128xf32>
    %72 = vector.shape_cast %71 : vector<1x1x128xf32> to vector<1x128xf32>
    %cst_30 = arith.constant dense<0.000000e+00> : vector<16xf32>
    %73 = vector.multi_reduction <add>, %68, %cst_30 [1] : vector<16x128xf32> to vector<16xf32>
    %74 = vector.shape_cast %73 : vector<16xf32> to vector<16x1xf32>
    %cst_31 = arith.constant 1.280000e+02 : f32
    %75 = vector.broadcast %cst_31 : f32 to vector<16x1xf32>
    %76 = arith.divf %74, %75 : vector<16x1xf32>
    %77 = vector.broadcast %76 : vector<16x1xf32> to vector<16x128xf32>
    %78 = arith.subf %68, %77 : vector<16x128xf32>
    %79 = arith.mulf %78, %78 : vector<16x128xf32>
    %cst_32 = arith.constant dense<0.000000e+00> : vector<16xf32>
    %80 = vector.multi_reduction <add>, %79, %cst_32 [1] : vector<16x128xf32> to vector<16xf32>
    %81 = vector.shape_cast %80 : vector<16xf32> to vector<16x1xf32>
    %cst_33 = arith.constant 1.280000e+02 : f32
    %82 = vector.broadcast %cst_33 : f32 to vector<16x1xf32>
    %83 = arith.divf %81, %82 : vector<16x1xf32>
    %84 = vector.broadcast %76 : vector<16x1xf32> to vector<16x128xf32>
    %85 = arith.subf %68, %84 : vector<16x128xf32>
    %cst_34 = arith.constant 9.99999996E-13 : f32
    %86 = vector.broadcast %cst_34 : f32 to vector<16x1xf32>
    %87 = arith.addf %83, %86 : vector<16x1xf32>
    %88 = math.rsqrt %87 : vector<16x1xf32>
    %89 = vector.broadcast %88 : vector<16x1xf32> to vector<16x128xf32>
    %90 = arith.mulf %85, %89 : vector<16x128xf32>
    %91 = vector.broadcast %70 : vector<1x128xf32> to vector<16x128xf32>
    %92 = arith.mulf %90, %91 : vector<16x128xf32>
    %93 = vector.broadcast %72 : vector<1x128xf32> to vector<16x128xf32>
    %94 = arith.addf %92, %93 : vector<16x128xf32>
    %95 = arith.truncf %94 : vector<16x128xf32> to vector<16x128xbf16>
    %c0_35 = arith.constant 0 : index
    %c0_36 = arith.constant 0 : index
    %c0_37 = arith.constant 0 : index
    %96 = vector.load %arg11[%c0_35, %c0_36, %c0_37] : memref<1x128x512xbf16, #tpu.memory_space<vmem>>, vector<1x128x512xbf16>
    %97 = vector.shape_cast %96 : vector<1x128x512xbf16> to vector<128x512xbf16>
    %cst_38 = arith.constant dense<0.000000e+00> : vector<16x512xf32>
    %98 = tpu.matmul %95, %97, %cst_38 {dimension_numbers = #tpu.dot_dimension_numbers<[1], [0], [0], [1], [0, 0, 1, 1], [], []>} : vector<16x128xbf16>, vector<128x512xbf16>, vector<16x512xf32> -> vector<16x512xf32>
    %c0_39 = arith.constant 0 : index
    %c0_40 = arith.constant 0 : index
    %c0_41 = arith.constant 0 : index
    %99 = vector.load %arg12[%c0_39, %c0_40, %c0_41] : memref<1x1x512xf32, #tpu.memory_space<vmem>>, vector<1x1x512xf32>
    %100 = vector.shape_cast %99 : vector<1x1x512xf32> to vector<1x512xf32>
    %101 = vector.broadcast %100 : vector<1x512xf32> to vector<16x512xf32>
    %102 = arith.addf %98, %101 : vector<16x512xf32>
    %103 = arith.mulf %102, %102 : vector<16x512xf32>
    %104 = arith.mulf %102, %103 : vector<16x512xf32>
    %cst_42 = arith.constant 4.471500e-02 : f32
    %105 = vector.broadcast %cst_42 : f32 to vector<16x512xf32>
    %106 = arith.mulf %105, %104 : vector<16x512xf32>
    %107 = arith.addf %102, %106 : vector<16x512xf32>
    %cst_43 = arith.constant 0.797884583 : f32
    %108 = vector.broadcast %cst_43 : f32 to vector<16x512xf32>
    %109 = arith.mulf %108, %107 : vector<16x512xf32>
    %110 = math.tanh %109 : vector<16x512xf32>
    %cst_44 = arith.constant 1.000000e+00 : f32
    %111 = vector.broadcast %cst_44 : f32 to vector<16x512xf32>
    %112 = arith.addf %111, %110 : vector<16x512xf32>
    %cst_45 = arith.constant 5.000000e-01 : f32
    %113 = vector.broadcast %cst_45 : f32 to vector<16x512xf32>
    %114 = arith.mulf %113, %112 : vector<16x512xf32>
    %115 = arith.mulf %102, %114 : vector<16x512xf32>
    %116 = arith.truncf %115 : vector<16x512xf32> to vector<16x512xbf16>
    %c0_46 = arith.constant 0 : index
    %c0_47 = arith.constant 0 : index
    %c0_48 = arith.constant 0 : index
    %117 = vector.load %arg13[%c0_46, %c0_47, %c0_48] : memref<1x512x128xbf16, #tpu.memory_space<vmem>>, vector<1x512x128xbf16>
    %118 = vector.shape_cast %117 : vector<1x512x128xbf16> to vector<512x128xbf16>
    %cst_49 = arith.constant dense<0.000000e+00> : vector<16x128xf32>
    %119 = tpu.matmul %116, %118, %cst_49 {dimension_numbers = #tpu.dot_dimension_numbers<[1], [0], [0], [1], [0, 0, 1, 1], [], []>} : vector<16x512xbf16>, vector<512x128xbf16>, vector<16x128xf32> -> vector<16x128xf32>
    %c0_50 = arith.constant 0 : index
    %c0_51 = arith.constant 0 : index
    %c0_52 = arith.constant 0 : index
    %120 = vector.load %arg14[%c0_50, %c0_51, %c0_52] : memref<1x1x128xf32, #tpu.memory_space<vmem>>, vector<1x1x128xf32>
    %121 = vector.shape_cast %120 : vector<1x1x128xf32> to vector<1x128xf32>
    %122 = vector.broadcast %121 : vector<1x128xf32> to vector<16x128xf32>
    %123 = arith.addf %119, %122 : vector<16x128xf32>
    %124 = arith.addf %94, %123 : vector<16x128xf32>
    %c0_53 = arith.constant 0 : index
    %c0_54 = arith.constant 0 : index
    %c0_55 = arith.constant 0 : index
    %125 = vector.load %arg15[%c0_53, %c0_54, %c0_55] : memref<1x1x128xf32, #tpu.memory_space<vmem>>, vector<1x1x128xf32>
    %126 = vector.shape_cast %125 : vector<1x1x128xf32> to vector<1x128xf32>
    %c0_56 = arith.constant 0 : index
    %c0_57 = arith.constant 0 : index
    %c0_58 = arith.constant 0 : index
    %127 = vector.load %arg16[%c0_56, %c0_57, %c0_58] : memref<1x1x128xf32, #tpu.memory_space<vmem>>, vector<1x1x128xf32>
    %128 = vector.shape_cast %127 : vector<1x1x128xf32> to vector<1x128xf32>
    %cst_59 = arith.constant dense<0.000000e+00> : vector<16xf32>
    %129 = vector.multi_reduction <add>, %124, %cst_59 [1] : vector<16x128xf32> to vector<16xf32>
    %130 = vector.shape_cast %129 : vector<16xf32> to vector<16x1xf32>
    %cst_60 = arith.constant 1.280000e+02 : f32
    %131 = vector.broadcast %cst_60 : f32 to vector<16x1xf32>
    %132 = arith.divf %130, %131 : vector<16x1xf32>
    %133 = vector.broadcast %132 : vector<16x1xf32> to vector<16x128xf32>
    %134 = arith.subf %124, %133 : vector<16x128xf32>
    %135 = arith.mulf %134, %134 : vector<16x128xf32>
    %cst_61 = arith.constant dense<0.000000e+00> : vector<16xf32>
    %136 = vector.multi_reduction <add>, %135, %cst_61 [1] : vector<16x128xf32> to vector<16xf32>
    %137 = vector.shape_cast %136 : vector<16xf32> to vector<16x1xf32>
    %cst_62 = arith.constant 1.280000e+02 : f32
    %138 = vector.broadcast %cst_62 : f32 to vector<16x1xf32>
    %139 = arith.divf %137, %138 : vector<16x1xf32>
    %140 = vector.broadcast %132 : vector<16x1xf32> to vector<16x128xf32>
    %141 = arith.subf %124, %140 : vector<16x128xf32>
    %cst_63 = arith.constant 9.99999996E-13 : f32
    %142 = vector.broadcast %cst_63 : f32 to vector<16x1xf32>
    %143 = arith.addf %139, %142 : vector<16x1xf32>
    %144 = math.rsqrt %143 : vector<16x1xf32>
    %145 = vector.broadcast %144 : vector<16x1xf32> to vector<16x128xf32>
    %146 = arith.mulf %141, %145 : vector<16x128xf32>
    %147 = vector.broadcast %126 : vector<1x128xf32> to vector<16x128xf32>
    %148 = arith.mulf %146, %147 : vector<16x128xf32>
    %149 = vector.broadcast %128 : vector<1x128xf32> to vector<16x128xf32>
    %150 = arith.addf %148, %149 : vector<16x128xf32>
    %151 = vector.shape_cast %150 : vector<16x128xf32> to vector<2x8x128xf32>
    %c0_64 = arith.constant 0 : index
    %c0_65 = arith.constant 0 : index
    %c0_66 = arith.constant 0 : index
    %152 = vector.load %arg22[%c0_64, %c0_65, %c0_66] : memref<2x8x128xf32, #tpu.memory_space<vmem>>, vector<2x8x128xf32>
    tpu.vector_store %arg22[%c0_64, %c0_65, %c0_66], %151 {strides = array<i32>} : memref<2x8x128xf32, #tpu.memory_space<vmem>>, vector<2x8x128xf32>,
    %c1_i32 = arith.constant 1 : i32
    %153 = arith.cmpi eq, %arg1, %c1_i32 : i32
    %154 = arith.extui %153 : i1 to i32
    %c0_i32_67 = arith.constant 0 : i32
    %155 = arith.cmpi ne, %154, %c0_i32_67 : i32
    scf.if %155 {
      %c0_68 = arith.constant 0 : index
      %c0_69 = arith.constant 0 : index
      %c0_70 = arith.constant 0 : index
      %156 = vector.load %arg22[%c0_68, %c0_69, %c0_70] : memref<2x8x128xf32, #tpu.memory_space<vmem>>, vector<2x1x128xf32>
      %157 = vector.shape_cast %156 : vector<2x1x128xf32> to vector<2x128xf32>
      %c0_71 = arith.constant 0 : index
      %c0_72 = arith.constant 0 : index
      %158 = vector.load %arg4[%c0_71, %c0_72] : memref<2x128xf32, #tpu.memory_space<vmem>>, vector<2x128xf32>
      %159 = arith.mulf %157, %158 : vector<2x128xf32>
      %160 = arith.truncf %159 : vector<2x128xf32> to vector<2x128xbf16>
      %c0_73 = arith.constant 0 : index
      %c0_74 = arith.constant 0 : index
      %161 = vector.load %arg17[%c0_73, %c0_74] : memref<128x128xbf16, #tpu.memory_space<vmem>>, vector<128x128xbf16>
      %cst_75 = arith.constant dense<0.000000e+00> : vector<2x128xf32>
      %162 = tpu.matmul %160, %161, %cst_75 {dimension_numbers = #tpu.dot_dimension_numbers<[1], [0], [0], [1], [0, 0, 1, 1], [], []>} : vector<2x128xbf16>, vector<128x128xbf16>, vector<2x128xf32> -> vector<2x128xf32>
      %c0_76 = arith.constant 0 : index
      %c0_77 = arith.constant 0 : index
      %163 = vector.load %arg18[%c0_76, %c0_77] : memref<1x128xf32, #tpu.memory_space<vmem>>, vector<1x128xf32>
      %164 = vector.broadcast %163 : vector<1x128xf32> to vector<2x128xf32>
      %165 = arith.addf %162, %164 : vector<2x128xf32>
      %cst_78 = arith.constant 0.000000e+00 : f32
      %166 = vector.broadcast %cst_78 : f32 to vector<2x128xf32>
      %167 = arith.maximumf %165, %166 : vector<2x128xf32>
      %168 = arith.truncf %167 : vector<2x128xf32> to vector<2x128xbf16>
      %c0_79 = arith.constant 0 : index
      %c0_80 = arith.constant 0 : index
      %169 = vector.load %arg19[%c0_79, %c0_80] : memref<128x128xbf16, #tpu.memory_space<vmem>>, vector<128x128xbf16>
      %cst_81 = arith.constant dense<0.000000e+00> : vector<2x128xf32>
      %170 = tpu.matmul %168, %169, %cst_81 {dimension_numbers = #tpu.dot_dimension_numbers<[1], [0], [0], [1], [0, 0, 1, 1], [], []>} : vector<2x128xbf16>, vector<128x128xbf16>, vector<2x128xf32> -> vector<2x128xf32>
      %c0_82 = arith.constant 0 : index
      %c0_83 = arith.constant 0 : index
      %171 = vector.load %arg20[%c0_82, %c0_83] : memref<1x128xf32, #tpu.memory_space<vmem>>, vector<1x128xf32>
      %172 = vector.broadcast %171 : vector<1x128xf32> to vector<2x128xf32>
      %173 = arith.addf %170, %172 : vector<2x128xf32>
      %c0_84 = arith.constant 0 : index
      %c0_85 = arith.constant 0 : index
      %174 = vector.load %arg21[%c0_84, %c0_85] : memref<2x128xf32, #tpu.memory_space<vmem>>, vector<2x128xf32>
      tpu.vector_store %arg21[%c0_84, %c0_85], %173 {strides = array<i32>} : memref<2x128xf32, #tpu.memory_space<vmem>>, vector<2x128xf32>,
    } else {
    }
    return
  }
  func.func @transform_0(%arg0: i32, %arg1: i32) -> (i32, i32, i32) {
    %c0_i32 = arith.constant 0 : i32
    %c0_i32_0 = arith.constant 0 : i32
    %c0_i32_1 = arith.constant 0 : i32
    return %arg0, %c0_i32, %c0_i32_0 : i32, i32, i32
  }
  func.func @transform_1(%arg0: i32, %arg1: i32) -> (i32, i32, i32) {
    %c0_i32 = arith.constant 0 : i32
    %c0_i32_0 = arith.constant 0 : i32
    %c0_i32_1 = arith.constant 0 : i32
    return %arg0, %c0_i32, %c0_i32_0 : i32, i32, i32
  }
  func.func @transform_2(%arg0: i32, %arg1: i32) -> (i32, i32) {
    %c0_i32 = arith.constant 0 : i32
    %c0_i32_0 = arith.constant 0 : i32
    return %arg0, %c0_i32 : i32, i32
  }
  func.func @transform_3(%arg0: i32, %arg1: i32) -> (i32, i32, i32) {
    %c0_i32 = arith.constant 0 : i32
    %c0_i32_0 = arith.constant 0 : i32
    %c0_i32_1 = arith.constant 0 : i32
    return %arg1, %c0_i32, %c0_i32_0 : i32, i32, i32
  }
  func.func @transform_4(%arg0: i32, %arg1: i32) -> (i32, i32, i32) {
    %c0_i32 = arith.constant 0 : i32
    %c0_i32_0 = arith.constant 0 : i32
    %c0_i32_1 = arith.constant 0 : i32
    return %arg1, %c0_i32, %c0_i32_0 : i32, i32, i32
  }
  func.func @transform_5(%arg0: i32, %arg1: i32) -> (i32, i32, i32) {
    %c0_i32 = arith.constant 0 : i32
    %c0_i32_0 = arith.constant 0 : i32
    %c0_i32_1 = arith.constant 0 : i32
    return %arg1, %c0_i32, %c0_i32_0 : i32, i32, i32
  }
  func.func @transform_6(%arg0: i32, %arg1: i32) -> (i32, i32, i32) {
    %c0_i32 = arith.constant 0 : i32
    %c0_i32_0 = arith.constant 0 : i32
    %c0_i32_1 = arith.constant 0 : i32
    return %arg1, %c0_i32, %c0_i32_0 : i32, i32, i32
  }
  func.func @transform_7(%arg0: i32, %arg1: i32) -> (i32, i32, i32) {
    %c0_i32 = arith.constant 0 : i32
    %c0_i32_0 = arith.constant 0 : i32
    %c0_i32_1 = arith.constant 0 : i32
    return %arg1, %c0_i32, %c0_i32_0 : i32, i32, i32
  }
  func.func @transform_8(%arg0: i32, %arg1: i32) -> (i32, i32, i32) {
    %c0_i32 = arith.constant 0 : i32
    %c0_i32_0 = arith.constant 0 : i32
    %c0_i32_1 = arith.constant 0 : i32
    return %arg1, %c0_i32, %c0_i32_0 : i32, i32, i32
  }
  func.func @transform_9(%arg0: i32, %arg1: i32) -> (i32, i32, i32) {
    %c0_i32 = arith.constant 0 : i32
    %c0_i32_0 = arith.constant 0 : i32
    %c0_i32_1 = arith.constant 0 : i32
    return %arg1, %c0_i32, %c0_i32_0 : i32, i32, i32
  }
  func.func @transform_10(%arg0: i32, %arg1: i32) -> (i32, i32, i32) {
    %c0_i32 = arith.constant 0 : i32
    %c0_i32_0 = arith.constant 0 : i32
    %c0_i32_1 = arith.constant 0 : i32
    return %arg1, %c0_i32, %c0_i32_0 : i32, i32, i32
  }
  func.func @transform_11(%arg0: i32, %arg1: i32) -> (i32, i32, i32) {
    %c0_i32 = arith.constant 0 : i32
    %c0_i32_0 = arith.constant 0 : i32
    %c0_i32_1 = arith.constant 0 : i32
    return %arg1, %c0_i32, %c0_i32_0 : i32, i32, i32
  }
  func.func @transform_12(%arg0: i32, %arg1: i32) -> (i32, i32, i32) {
    %c0_i32 = arith.constant 0 : i32
    %c0_i32_0 = arith.constant 0 : i32
    %c0_i32_1 = arith.constant 0 : i32
    return %arg1, %c0_i32, %c0_i32_0 : i32, i32, i32
  }
  func.func @transform_13(%arg0: i32, %arg1: i32) -> (i32, i32, i32) {
    %c0_i32 = arith.constant 0 : i32
    %c0_i32_0 = arith.constant 0 : i32
    %c0_i32_1 = arith.constant 0 : i32
    return %arg1, %c0_i32, %c0_i32_0 : i32, i32, i32
  }
  func.func @transform_14(%arg0: i32, %arg1: i32) -> (i32, i32, i32) {
    %c0_i32 = arith.constant 0 : i32
    %c0_i32_0 = arith.constant 0 : i32
    %c0_i32_1 = arith.constant 0 : i32
    return %arg1, %c0_i32, %c0_i32_0 : i32, i32, i32
  }
  func.func @transform_15(%arg0: i32, %arg1: i32) -> (i32, i32) {
    %c0_i32 = arith.constant 0 : i32
    %c0_i32_0 = arith.constant 0 : i32
    %c0_i32_1 = arith.constant 0 : i32
    return %c0_i32, %c0_i32_0 : i32, i32
  }
  func.func @transform_16(%arg0: i32, %arg1: i32) -> (i32, i32) {
    %c0_i32 = arith.constant 0 : i32
    %c0_i32_0 = arith.constant 0 : i32
    %c0_i32_1 = arith.constant 0 : i32
    return %c0_i32, %c0_i32_0 : i32, i32
  }
  func.func @transform_17(%arg0: i32, %arg1: i32) -> (i32, i32) {
    %c0_i32 = arith.constant 0 : i32
    %c0_i32_0 = arith.constant 0 : i32
    %c0_i32_1 = arith.constant 0 : i32
    return %c0_i32, %c0_i32_0 : i32, i32
  }
  func.func @transform_18(%arg0: i32, %arg1: i32) -> (i32, i32) {
    %c0_i32 = arith.constant 0 : i32
    %c0_i32_0 = arith.constant 0 : i32
    %c0_i32_1 = arith.constant 0 : i32
    return %c0_i32, %c0_i32_0 : i32, i32
  }
  func.func @transform_19(%arg0: i32, %arg1: i32) -> (i32, i32) {
    %c0_i32 = arith.constant 0 : i32
    %c0_i32_0 = arith.constant 0 : i32
    return %arg0, %c0_i32 : i32, i32
  }
}

</mosaic_0001>

<bundles_post_ra>
// kernel: tpu_custom_call.1
= control target key start
LH: loop header
LB: loop body
LE: loop exit
PB: predicated region body
PF: predicated region fallthrough
CT: control target
= control target key end

     0   :  { %s5893_s0 = inlined_call_operand.hbm [shape: bf16[2,8,128], index: 0, kind: input, shape index: {}]   ;;  %s5894_s1 = inlined_call_operand.hbm [shape: f32[4,1,8], index: 1, kind: input, shape index: {}]   ;;  %s5895_s2 = inlined_call_operand.hbm [shape: f32[2,128], index: 2, kind: input, shape index: {}]   ;;  %s5896_s3 = inlined_call_operand.hbm [shape: bf16[2,128,384], index: 3, kind: input, shape index: {}]   ;;  %s5897_s4 = inlined_call_operand.hbm [shape: f32[2,1,384], index: 4, kind: input, shape index: {}]   ;;  %s5898_s5 = inlined_call_operand.hbm [shape: bf16[2,128,128], index: 5, kind: input, shape index: {}]   ;;  %s5899_s6 = inlined_call_operand.hbm [shape: f32[2,1,128], index: 6, kind: input, shape index: {}]   ;;  %s5900_s7 = inlined_call_operand.hbm [shape: f32[2,1,128], index: 7, kind: input, shape index: {}]   ;;  %s5901_s8 = inlined_call_operand.hbm [shape: f32[2,1,128], index: 8, kind: input, shape index: {}]   ;;  %s5902_s9 = inlined_call_operand.hbm [shape: bf16[2,128,512], index: 9, kind: input, shape index: {}]   ;;  %s5903_s10 = inlined_call_operand.hbm [shape: f32[2,1,512], index: 10, kind: input, shape index: {}]   ;;  %s5904_s11 = inlined_call_operand.hbm [shape: bf16[2,512,128], index: 11, kind: input, shape index: {}]   ;;  %s5905_s12 = inlined_call_operand.hbm [shape: f32[2,1,128], index: 12, kind: input, shape index: {}]   ;;  %s5906_s13 = inlined_call_operand.hbm [shape: f32[2,1,128], index: 13, kind: input, shape index: {}]   ;;  %s5907_s14 = inlined_call_operand.hbm [shape: f32[2,1,128], index: 14, kind: input, shape index: {}]   ;;  %s5908_s15 = inlined_call_operand.hbm [shape: bf16[128,128], index: 15, kind: input, shape index: {}]   ;;  %s5909_s16 = inlined_call_operand.hbm [shape: f32[1,128], index: 16, kind: input, shape index: {}]   ;;  %s5910_s17 = inlined_call_operand.vmem [shape: bf16[128,128], index: 17, kind: input, shape index: {}]   ;;  %s5911_s18 = inlined_call_operand.vmem [shape: f32[1,128], index: 18, kind: input, shape index: {}]   ;;  %s5912_s19 = inlined_call_operand.hbm [shape: f32[2,128], index: 19, kind: output, shape index: {}]  }
   0x1   :  { %5957 = sst [smem:[#allocation49_spill]] %s5893_s0 }
   0x2   :  { %5958 = sst [smem:[#allocation50_spill]] %s5894_s1 }
   0x3   :  { %5959 = sst [smem:[#allocation51_spill]] %s5895_s2 }
   0x4   :  { %5960 = sst [smem:[#allocation52_spill]] %s5896_s3 }
   0x5   :  { %5961 = sst [smem:[#allocation53_spill]] %s5897_s4 }
   0x6   :  { %5962 = sst [smem:[#allocation54_spill]] %s5898_s5 }
   0x7   :  { %5963 = sst [smem:[#allocation55_spill]] %s5900_s7 }
   0x8   :  { %5964 = sst [smem:[#allocation56_spill]] %s5901_s8 }
   0x9   :  { %5965 = sst [smem:[#allocation57_spill]] %s5902_s9 }
   0xa   :  { %5966 = sst [smem:[#allocation58_spill]] %s5903_s10 }
   0xb   :  { %5967 = sst [smem:[#allocation59_spill]] %s5905_s12 }
   0xc   :  { %5968 = sst [smem:[#allocation60_spill]] %s5907_s14 }
   0xd   :  { %5969 = sst [smem:[#allocation61_spill]] %s5908_s15 }
   0xe   :  { %5970 = sst [smem:[#allocation62_spill]] %s5910_s17 }
   0xf   :  { %5971 = sst [smem:[#allocation63_spill]] %s5911_s18 }
  0x10   :  { %5972 = sst [smem:[#allocation64_spill]] %s5912_s19 }
  0x11   :  { %24 = vsyncpa [#allocation4], 0 }
  0x12   :  { %25 = vsyncpa [#allocation7], 0 }
  0x13   :  { %26 = vsyncpa [#allocation10], 0 }
  0x14   :  { %28 = vsyncpa [#allocation10 + $0x1], 0 }
  0x15   :  { %29 = vsyncpa [#allocation13], 0 }
  0x16   :  { %31 = vsyncpa [#allocation13 + $0x1], 0 }
  0x17   :  { %32 = vsyncpa [#allocation16], 0 }
  0x18   :  { %34 = vsyncpa [#allocation16 + $0x1], 0 }
  0x19   :  { %35 = vsyncpa [#allocation19], 0 }
  0x1a   :  { %37 = vsyncpa [#allocation19 + $0x1], 0 }
  0x1b   :  { %38 = vsyncpa [#allocation22], 0 }
  0x1c   :  { %40 = vsyncpa [#allocation22 + $0x1], 0 }
  0x1d   :  { %41 = vsyncpa [#allocation25], 0 }
  0x1e   :  { %43 = vsyncpa [#allocation25 + $0x1], 0 }
  0x1f   :  { %44 = vsyncpa [#allocation28], 0 }
  0x20   :  { %45 = vsyncpa [#allocation5], 0  ;;  %s4909_s0 = smov 0   ;;  %s4911_s30 = smov 0  }
  0x21   :  { %s4913_s20 = smov 0   ;;  %s4915_s21 = smov 0  }
  0x22   :  { %s4917_s1 = smov 0   ;;  %s4919_s22 = smov 0  }
  0x23 LB: > { %5973 = sst [smem:[#allocation41_spill]] %s4760_s30  ;;  %s4938_s2 = sadd.s32 4294967295, %s4776_s22   ;;  %s4776_s22 = sphi %s4919_s22, %s51_s22   ;;  %s4772_s1 = sphi %s4917_s1, %s6048_s1   ;;  %s4768_s21 = sphi %s4915_s21, %s6047_s21   ;;  %s4764_s20 = sphi %s4913_s20, %s6045_s20   ;;  %s4760_s30 = sphi %s4911_s30, %s6044_s30   ;;  %s4756_s0 = sphi %s4909_s0, %s6043_s0  }
  0x24   : > { %5974 = sst [smem:[#allocation42_spill]] %s4764_s20  ;;  %p155_p0 = scmp.ne.s32.totalorder %s4764_s20, %s4760_s30 }
  0x25   : > { %5975 = sst [smem:[#allocation43_spill]] %s4768_s21  ;;  %p156_p1 = scmp.eq.s32.totalorder %s4776_s22, 0 }
  0x26   : > { %5976 = sst [smem:[#allocation44_spill]] %s4938_s2  ;;  %p161_p2 = scmp.ne.s32.totalorder %s4760_s30, %s4756_s0 }
  0x27   : > { %p5922_p3 = scmp.eq.s32.totalorder %s4938_s2, 0  ;;  %p157_p4 = por %p156_p1, %p155_p0 }
  0x28   : > { %p3389_p5 = scmp.ge.s32.totalorder %s4776_s22, 1  ;;  %p568_p7 = scmp.lt.s32.totalorder %s4776_s22, 3 }
  0x29   : > { %p4949_p6 = por %p5922_p3, %p161_p2  ;;  %s4778_s3 = smov [#allocation6]  }
  0x2a   : > { %p4954_p8 = pnand %p3389_p5, %p568_p7  ;;  %s599_s26 = sshll.u32 %s4778_s3, 4  ;;  %s600_s26 = int_to_ptr.vmem [resolvable:$true] %s599_s26 }
  0x2b   : > { %s5977_s24 = scalar_select %p4949_p6, 1, 0 }
  0x2c   : > { %s5979_s25 = scalar_select %p4954_p8, 1, 0 }
  0x2d   : > { %5978 = sst [smem:[#allocation45_spill]] %s5977_s24  ;;  %p3850_p9 = pneg %p4954_p8 }
  0x2e   : > { %5980 = sst [smem:[#allocation46_spill]] %s5979_s25  ;;  %p3908_p10 = scmp.lt.s32.totalorder %s4776_s22, 2 }
  0x2f   : > { %p4963_p11 = pnand %p3850_p9, %p5922_p3  ;;  %s4968_s28 = sand.u32 1, %s4764_s20  }
  0x30   : > { %p4970_p12 = pnand %p3908_p10, %p157_p4  ;;  %s5983_s19 = sld [smem:[#allocation50_spill]] }
  0x31   : > { %s5981_s27 = scalar_select %p4963_p11, 1, 0 }
  0x32   : > { %s5982_s29 = scalar_select %p4970_p12, 1, 0 }
  0x33   : > { %p4982_p0 = pneg %p4963_p11 }
  0x35   : > { %s5984_s21 = scalar_select %p4982_p0, 1, 0 }
  0x36   : > { %s4164_s3 = scalar_lea.hbm %s5983_s19, 64 }
  0x37   : > { %p4165_p13 = scmp.ne.s32.totalorder %s5983_s19, %s4164_s3  ;;  %p4171_p4 = scmp.lt.u32.totalorder %s4164_s3, %s5983_s19 }
  0x39   : > { %p4167_p1 = pnand %p4982_p0, %p4165_p13 }
  0x3b   : > { %p4168_p2 = pneg %p4167_p1 }
  0x3d   : > { %p4173_p5 = pnand %p4171_p4, %p4168_p2 }
  0x3f   : > { %4176 = shalt.err (!%p4173_p5)
}
  0x40   : > { %s4177_s23 = scalar_lea.vmem %s600_s26, 64  ;;  %p4185_p3 = scmp.lt.s32.totalorder %s600_s26, %s600_s26 }
  0x41   : > { %p4178_p7 = scmp.ne.s32.totalorder %s600_s26, %s4177_s23  ;;  %p4186_p6 = scmp.lt.s32.totalorder %s4177_s23, %s4177_s23 }
  0x43   : > { %p4180_p9 = pnand %p4178_p7, %p4982_p0  ;;  %p4187_p8 = por %p4186_p6, %p4185_p3 }
  0x45   : > { %p4181_p10 = pneg %p4180_p9 }
  0x47   : > { %p4188_p12 = pnand %p4187_p8, %p4181_p10 }
  0x49   : > { %4191 = shalt.err (!%p4188_p12)
}
  0x4a   : > { %s5934_s17 = smov 16   ;;  %s4780_s18 = smov 1  }
  0x4b   : > { %3856 = dma.hbm_to_vmem [thread:$0]  (!%p4963_p11), %s5983_s19, 64, %s600_s26, [#allocation7], %s5934_s17, %s5934_s17, %s4780_s18  }
  0x4c   : > { %s4781_s0 = smov [#allocation27]   ;;  %s5985_s15 = sld [smem:[#allocation61_spill]] }
  0x4d   : > { %s625_s3 = sshll.u32 %s4781_s0, 4  ;;  %s626_s3 = int_to_ptr.vmem [resolvable:$true] %s625_s3 }
  0x52   : > { %s4192_s23 = scalar_lea.hbm %s5985_s15, 1024 }
  0x53   : > { %p4193_p3 = scmp.ne.s32.totalorder %s5985_s15, %s4192_s23  ;;  %p4199_p12 = scmp.lt.u32.totalorder %s4192_s23, %s5985_s15 }
  0x55   : > { %p4195_p6 = pnand %p4193_p3, %p4982_p0 }
  0x57   : > { %p4196_p8 = pneg %p4195_p6 }
  0x59   : > { %p4201_p13 = pnand %p4199_p12, %p4196_p8 }
  0x5b   : > { %4204 = shalt.err (!%p4201_p13)
}
  0x5c   : > { %s4205_s26 = scalar_lea.vmem %s626_s3, 1024  ;;  %p4213_p5 = scmp.lt.s32.totalorder %s626_s3, %s626_s3 }
  0x5d   : > { %p4206_p1 = scmp.ne.s32.totalorder %s626_s3, %s4205_s26  ;;  %p4214_p7 = scmp.lt.s32.totalorder %s4205_s26, %s4205_s26 }
  0x5f   : > { %p4208_p2 = pnand %p4206_p1, %p4982_p0  ;;  %p4215_p9 = por %p4214_p7, %p4213_p5 }
  0x61   : > { %p4209_p4 = pneg %p4208_p2 }
  0x63   : > { %p4216_p10 = pnand %p4215_p9, %p4209_p4 }
  0x65   : > { %4219 = shalt.err (!%p4216_p10)
}
  0x66   : > { %s5936_s12 = smov 64   ;;  %s5938_s8 = smov 4  }
  0x67   : > { %3862 = dma.hbm_to_vmem [thread:$0]  (!%p4963_p11), %s5985_s15, 1024, %s626_s3, [#allocation28], %s5936_s12, %s5936_s12, %s5938_s8  }
  0x68   : > { %s60_s2 = sadd.s32 1, %s4772_s1  ;;  %s5023_s25 = sand.u32 1, %s4776_s22  }
  0x69   : > { %p61_p3 = scmp.ge.s32.totalorder %s60_s2, 2  ;;  %s3796_s18 = smul.u32 192, %s4968_s28 }
  0x6a   : > { %s3797_s30 = smul.u32 3072, %s4772_s1  ;;  %s5987_s19 = sld [smem:[#allocation52_spill]] }
  0x6b   : > { %s6050_s2 = smov (%p61_p3, %s60_s2), 0  ;;  %s660_s0 = scalar_lea.vmem [#allocation9], %s3796_s18 }
  0x6c   : > { %5986 = sst [smem:[#allocation47_spill]] %s6050_s2  ;;  %s145_s24 = ssub.s32 %s4772_s1, %s6050_s2 }
  0x6d   : > { %s667_s23 = sshll.u32 %s660_s0, 4  ;;  %p146_p6 = scmp.eq.s32.totalorder %s145_s24, 0  ;;  %s5036_s23 = int_to_ptr.vmem [resolvable:$true] %s667_s23 }
  0x6e   : > { %s5988_s3 = sadd.s32 1, %s4764_s20  ;;  %s5948_s12 = scalar_lea.sflag [#allocation10], %s5023_s25 }
  0x6f   : > { %s5041_s14 = scalar_select %p146_p6, %s4764_s20, %s5988_s3  }
  0x70   : > { %s5034_s10 = scalar_lea.hbm %s5987_s19, %s3797_s30  ;;  %p5990_p12 = scmp.ne.s32.totalorder %s5982_s29, 0 }
  0x71   : > { %5989 = sst [smem:[#allocation48_spill]] %s5041_s14  ;;  %s4220_s8 = scalar_lea.hbm %s5034_s10, 3072 }
  0x72   : > { %p4221_p8 = scmp.ne.s32.totalorder %s5034_s10, %s4220_s8  ;;  %p5048_p13 = pneg %p5990_p12 }
  0x73   : > { %s4225_s24 = scalar_lea.hbm %s5987_s19, 6144  ;;  %p4226_p4 = scmp.lt.u32.totalorder %s5034_s10, %s5987_s19 }
  0x74   : > { %s5991_s18 = scalar_select %p5048_p13, 1, 0 }
  0x75   : > { %p4223_p1 = pnand %p5048_p13, %p4221_p8  ;;  %p4227_p5 = scmp.lt.u32.totalorder %s4225_s24, %s4220_s8 }
  0x76   : > { %p4229_p9 = scmp.lt.u32.totalorder %s4220_s8, %s5034_s10 }
  0x77   : > { %p4224_p2 = pneg %p4223_p1  ;;  %p4228_p7 = por %p4227_p5, %p4226_p4 }
  0x79   : > { %p4230_p10 = por %p4229_p9, %p4228_p7 }
  0x7b   : > { %p4231_p3 = pnand %p4230_p10, %p4224_p2 }
  0x7d   : > { %4234 = shalt.err (!%p4231_p3)
}
  0x7e   : > { %s4235_s3 = scalar_lea.vmem %s5036_s23, 3072  ;;  %s4784_s17 = smov [#allocation9]  }
  0x7f   : > { %p4236_p6 = scmp.ne.s32.totalorder %s5036_s23, %s4235_s3  ;;  %s4240_s30 = sshll.u32 %s4784_s17, 4  ;;  %s4241_s30 = int_to_ptr.vmem [resolvable:$false] %s4240_s30 }
  0x80   : > { %s4242_s0 = scalar_lea.vmem %s4241_s30, 6144  ;;  %p4243_p11 = scmp.lt.s32.totalorder %s5036_s23, %s4241_s30 }
  0x81   : > { %p4238_p8 = pnand %p4236_p6, %p5048_p13  ;;  %p4244_p0 = scmp.lt.s32.totalorder %s4242_s0, %s4235_s3 }
  0x83   : > { %p4239_p1 = pneg %p4238_p8  ;;  %p4245_p4 = por %p4244_p0, %p4243_p11 }
  0x85   : > { %p4246_p5 = pnand %p4245_p4, %p4239_p1 }
  0x87   : > { %4249 = shalt.err (!%p4246_p5)
}
  0x88   : > { %s4785_s8 = smov 192   ;;  %s4786_s24 = smov 12  }
  0x89   : > { %3869 = dma.hbm_to_vmem [thread:$0]  (!%p5990_p12), %s5034_s10, 3072, %s5036_s23, %s5948_s12, %s4785_s8, %s4785_s8, %s4786_s24  }
  0x8a   : > { %s3398_s26 = sshll.u32 %s4968_s28, 6  ;;  %s3564_s17 = sshll.u32 %s4772_s1, 10 }
  0x8b   : > { %s5992_s5 = sld [smem:[#allocation54_spill]]  ;;  %s700_s15 = scalar_lea.vmem [#allocation12], %s3398_s26 }
  0x8c   : > { %s707_s19 = sshll.u32 %s700_s15, 4  ;;  %s5083_s2 = sshll.u32 %s4772_s1, 4  ;;  %s5080_s19 = int_to_ptr.vmem [resolvable:$true] %s707_s19 }
  0x8d   : > { %s5947_s14 = scalar_lea.sflag [#allocation13], %s5023_s25 }
  0x91   : > { %s5078_s0 = scalar_lea.hbm %s5992_s5, %s3564_s17  ;;  %s4255_s8 = scalar_lea.hbm %s5992_s5, 2048 }
  0x92   : > { %s4250_s20 = scalar_lea.hbm %s5078_s0, 1024  ;;  %p4256_p7 = scmp.lt.u32.totalorder %s5078_s0, %s5992_s5 }
  0x93   : > { %p4251_p11 = scmp.ne.s32.totalorder %s5078_s0, %s4250_s20  ;;  %p4257_p9 = scmp.lt.u32.totalorder %s4255_s8, %s4250_s20 }
  0x94   : > { %p4259_p3 = scmp.lt.u32.totalorder %s4250_s20, %s5078_s0 }
  0x95   : > { %p4253_p0 = pnand %p4251_p11, %p5048_p13  ;;  %p4258_p10 = por %p4257_p9, %p4256_p7 }
  0x97   : > { %p4254_p2 = pneg %p4253_p0  ;;  %p4260_p6 = por %p4259_p3, %p4258_p10 }
  0x99   : > { %p4261_p8 = pnand %p4260_p6, %p4254_p2 }
  0x9b   : > { %4264 = shalt.err (!%p4261_p8)
}
  0x9c   : > { %s4265_s15 = scalar_lea.vmem %s5080_s19, 1024  ;;  %s4787_s26 = smov [#allocation12]  }
  0x9d   : > { %p4266_p1 = scmp.ne.s32.totalorder %s5080_s19, %s4265_s15  ;;  %s4270_s3 = sshll.u32 %s4787_s26, 4  ;;  %s4271_s3 = int_to_ptr.vmem [resolvable:$false] %s4270_s3 }
  0x9e   : > { %s4272_s30 = scalar_lea.vmem %s4271_s3, 2048  ;;  %p4273_p11 = scmp.lt.s32.totalorder %s5080_s19, %s4271_s3 }
  0x9f   : > { %p4268_p4 = pnand %p4266_p1, %p5048_p13  ;;  %p4274_p0 = scmp.lt.s32.totalorder %s4272_s30, %s4265_s15 }
  0xa1   : > { %p4269_p5 = pneg %p4268_p4  ;;  %p4275_p7 = por %p4274_p0, %p4273_p11 }
  0xa3   : > { %p4276_p9 = pnand %p4275_p7, %p4269_p5 }
  0xa5   : > { %4279 = shalt.err (!%p4276_p9)
}
  0xa6   : > { %s5993_s20 = smov 4   ;;  %s5994_s23 = smov 64  }
  0xa7   : > { %3875 = dma.hbm_to_vmem [thread:$0]  (!%p5990_p12), %s5078_s0, 1024, %s5080_s19, %s5947_s14, %s5994_s23, %s5994_s23, %s5993_s20  }
  0xa8   : > { %s5995_s7 = sld [smem:[#allocation55_spill]]  ;;  %s737_s17 = scalar_lea.vmem [#allocation15], %s4968_s28 }
  0xa9   : > { %s744_s15 = sshll.u32 %s737_s17, 4  ;;  %s5950_s26 = scalar_lea.sflag [#allocation16], %s5023_s25  ;;  %s745_s15 = int_to_ptr.vmem [resolvable:$true] %s744_s15 }
  0xae   : > { %s5116_s24 = scalar_lea.hbm %s5995_s7, %s5083_s2  ;;  %s4285_s0 = scalar_lea.hbm %s5995_s7, 32 }
  0xaf   : > { %s4280_s3 = scalar_lea.hbm %s5116_s24, 16  ;;  %p4286_p6 = scmp.lt.u32.totalorder %s5116_s24, %s5995_s7 }
  0xb0   : > { %p4281_p2 = scmp.ne.s32.totalorder %s5116_s24, %s4280_s3  ;;  %p4287_p8 = scmp.lt.u32.totalorder %s4285_s0, %s4280_s3 }
  0xb1   : > { %p4289_p4 = scmp.lt.u32.totalorder %s4280_s3, %s5116_s24 }
  0xb2   : > { %p4283_p10 = pnand %p4281_p2, %p5048_p13  ;;  %p4288_p1 = por %p4287_p8, %p4286_p6 }
  0xb4   : > { %p4284_p3 = pneg %p4283_p10  ;;  %p4290_p5 = por %p4289_p4, %p4288_p1 }
  0xb6   : > { %p4291_p11 = pnand %p4290_p5, %p4284_p3 }
  0xb8   : > { %4294 = shalt.err (!%p4291_p11)
}
  0xb9   : > { %s4295_s17 = scalar_lea.vmem %s745_s15, 16  ;;  %s4788_s14 = smov [#allocation15]  }
  0xba   : > { %p4296_p0 = scmp.ne.s32.totalorder %s745_s15, %s4295_s17  ;;  %s4300_s12 = sshll.u32 %s4788_s14, 4  ;;  %s4301_s12 = int_to_ptr.vmem [resolvable:$false] %s4300_s12 }
  0xbb   : > { %s4302_s30 = scalar_lea.vmem %s4301_s12, 32  ;;  %p4303_p2 = scmp.lt.s32.totalorder %s745_s15, %s4301_s12 }
  0xbc   : > { %p4298_p7 = pnand %p4296_p0, %p5048_p13  ;;  %p4304_p10 = scmp.lt.s32.totalorder %s4302_s30, %s4295_s17 }
  0xbe   : > { %p4299_p9 = pneg %p4298_p7  ;;  %p4305_p12 = por %p4304_p10, %p4303_p2 }
  0xc0   : > { %p4306_p6 = pnand %p4305_p12, %p4299_p9 }
  0xc2   : > { %4309 = shalt.err (!%p4306_p6)
}
  0xc3   : > { %p5996_p8 = scmp.ne.s32.totalorder %s5982_s29, 0  ;;  %s3404_s14 = sshll.u32 %s4968_s28, 8 }
  0xc4   : > { %s3565_s3 = sshll.u32 %s4772_s1, 12  ;;  %s5997_s9 = sld [smem:[#allocation57_spill]] }
  0xc5   : > { %3881 = dma.hbm_to_vmem [thread:$0]  (!%p5996_p8), %s5116_s24, 16, %s745_s15, %s5950_s26  }
  0xc6   : > { %s772_s10 = scalar_lea.vmem [#allocation18], %s3404_s14  ;;  %s5953_s17 = scalar_lea.sflag [#allocation19], %s5023_s25 }
  0xc7   : > { %s779_s8 = sshll.u32 %s772_s10, 4  ;;  %s5150_s8 = int_to_ptr.vmem [resolvable:$true] %s779_s8 }
  0xca   : > { %s5146_s0 = scalar_lea.hbm %s5997_s9, %s3565_s3  ;;  %s4315_s12 = scalar_lea.hbm %s5997_s9, 8192 }
  0xcb   : > { %s4310_s30 = scalar_lea.hbm %s5146_s0, 4096  ;;  %p4316_p4 = scmp.lt.u32.totalorder %s5146_s0, %s5997_s9 }
  0xcc   : > { %p4311_p12 = scmp.ne.s32.totalorder %s5146_s0, %s4310_s30  ;;  %p4317_p5 = scmp.lt.u32.totalorder %s4315_s12, %s4310_s30 }
  0xcd   : > { %p4319_p0 = scmp.lt.u32.totalorder %s4310_s30, %s5146_s0 }
  0xce   : > { %p4313_p3 = pnand %p4311_p12, %p5048_p13  ;;  %p4318_p11 = por %p4317_p5, %p4316_p4 }
  0xd0   : > { %p4314_p1 = pneg %p4313_p3  ;;  %p4320_p7 = por %p4319_p0, %p4318_p11 }
  0xd2   : > { %p4321_p9 = pnand %p4320_p7, %p4314_p1 }
  0xd4   : > { %4324 = shalt.err (!%p4321_p9)
}
  0xd5   : > { %s4325_s10 = scalar_lea.vmem %s5150_s8, 4096  ;;  %s4789_s24 = smov [#allocation18]  }
  0xd6   : > { %p4326_p2 = scmp.ne.s32.totalorder %s5150_s8, %s4325_s10  ;;  %s4330_s15 = sshll.u32 %s4789_s24, 4  ;;  %s4331_s15 = int_to_ptr.vmem [resolvable:$false] %s4330_s15 }
  0xd7   : > { %s4332_s26 = scalar_lea.vmem %s4331_s15, 8192  ;;  %p4333_p12 = scmp.lt.s32.totalorder %s5150_s8, %s4331_s15 }
  0xd8   : > { %p4328_p10 = pnand %p4326_p2, %p5048_p13  ;;  %p4334_p3 = scmp.lt.s32.totalorder %s4332_s26, %s4325_s10 }
  0xda   : > { %p4329_p6 = pneg %p4328_p10  ;;  %p4335_p4 = por %p4334_p3, %p4333_p12 }
  0xdc   : > { %p4336_p5 = pnand %p4335_p4, %p4329_p6 }
  0xde   : > { %4339 = shalt.err (!%p4336_p5)
}
  0xdf   : > { %s4790_s30 = smov 256   ;;  %s5998_s12 = smov 16  }
  0xe0   : > { %3887 = dma.hbm_to_vmem [thread:$0]  (!%p5996_p8), %s5146_s0, 4096, %s5150_s8, %s5953_s17, %s4790_s30, %s4790_s30, %s5998_s12  }
  0xe1   : > { %s5182_s10 = scalar_lea.hbm %s5904_s11, %s3565_s3  ;;  %s812_s15 = scalar_lea.vmem [#allocation21], %s3404_s14 }
  0xe2   : > { %s819_s26 = sshll.u32 %s812_s15, 4  ;;  %s5952_s5 = scalar_lea.sflag [#allocation22], %s5023_s25  ;;  %s5186_s26 = int_to_ptr.vmem [resolvable:$true] %s819_s26 }
  0xe3   : > { %s4340_s7 = scalar_lea.hbm %s5182_s10, 4096  ;;  %s4345_s3 = scalar_lea.hbm %s5904_s11, 8192 }
  0xe4   : > { %p4341_p1 = scmp.ne.s32.totalorder %s5182_s10, %s4340_s7  ;;  %p4346_p7 = scmp.lt.u32.totalorder %s5182_s10, %s5904_s11 }
  0xe5   : > { %p4347_p9 = scmp.lt.u32.totalorder %s4345_s3, %s4340_s7  ;;  %p4349_p10 = scmp.lt.u32.totalorder %s4340_s7, %s5182_s10 }
  0xe6   : > { %p4343_p11 = pnand %p4341_p1, %p5048_p13 }
  0xe7   : > { %p4348_p2 = por %p4347_p9, %p4346_p7 }
  0xe8   : > { %p4344_p0 = pneg %p4343_p11 }
  0xe9   : > { %p4350_p6 = por %p4349_p10, %p4348_p2 }
  0xeb   : > { %p4351_p12 = pnand %p4350_p6, %p4344_p0 }
  0xed   : > { %4354 = shalt.err (!%p4351_p12)
}
  0xee   : > { %s4355_s14 = scalar_lea.vmem %s5186_s26, 4096  ;;  %s4791_s19 = smov [#allocation21]  }
  0xef   : > { %p4356_p3 = scmp.ne.s32.totalorder %s5186_s26, %s4355_s14  ;;  %s4360_s24 = sshll.u32 %s4791_s19, 4  ;;  %s4361_s24 = int_to_ptr.vmem [resolvable:$false] %s4360_s24 }
  0xf0   : > { %s4362_s15 = scalar_lea.vmem %s4361_s24, 8192  ;;  %p4363_p1 = scmp.lt.s32.totalorder %s5186_s26, %s4361_s24 }
  0xf1   : > { %p4358_p4 = pnand %p4356_p3, %p5048_p13  ;;  %p4364_p11 = scmp.lt.s32.totalorder %s4362_s15, %s4355_s14 }
  0xf3   : > { %p4359_p5 = pneg %p4358_p4  ;;  %p4365_p7 = por %p4364_p11, %p4363_p1 }
  0xf5   : > { %p4366_p9 = pnand %p4365_p7, %p4359_p5 }
  0xf7   : > { %4369 = shalt.err (!%p4366_p9)
}
  0xf8   : > { %3893 = dma.hbm_to_vmem [thread:$0]  (!%p5996_p8), %s5182_s10, 4096, %s5186_s26, %s5952_s5, %s5994_s23, %s5994_s23, %s5993_s20  }
  0xf9   : > { %s5219_s8 = scalar_lea.hbm %s5906_s13, %s5083_s2  ;;  %s849_s3 = scalar_lea.vmem [#allocation24], %s4968_s28 }
  0xfa   : > { %s856_s30 = sshll.u32 %s849_s3, 4  ;;  %s5956_s12 = scalar_lea.sflag [#allocation25], %s5023_s25  ;;  %s857_s30 = int_to_ptr.vmem [resolvable:$true] %s856_s30 }
  0xfb   : > { %s4370_s14 = scalar_lea.hbm %s5219_s8, 16  ;;  %s4375_s26 = scalar_lea.hbm %s5906_s13, 32 }
  0xfc   : > { %p4371_p0 = scmp.ne.s32.totalorder %s5219_s8, %s4370_s14  ;;  %p4376_p6 = scmp.lt.u32.totalorder %s5219_s8, %s5906_s13 }
  0xfd   : > { %p4377_p12 = scmp.lt.u32.totalorder %s4375_s26, %s4370_s14  ;;  %p4379_p4 = scmp.lt.u32.totalorder %s4370_s14, %s5219_s8 }
  0xfe   : > { %p4373_p2 = pnand %p4371_p0, %p5048_p13 }
  0xff   : > { %p4378_p3 = por %p4377_p12, %p4376_p6 }
 0x100   : > { %p4374_p10 = pneg %p4373_p2 }
 0x101   : > { %p4380_p5 = por %p4379_p4, %p4378_p3 }
 0x103   : > { %p4381_p1 = pnand %p4380_p5, %p4374_p10 }
 0x105   : > { %4384 = shalt.err (!%p4381_p1)
}
 0x106   : > { %s4385_s7 = scalar_lea.vmem %s857_s30, 16  ;;  %s4792_s0 = smov [#allocation24]  }
 0x107   : > { %p4386_p11 = scmp.ne.s32.totalorder %s857_s30, %s4385_s7  ;;  %s4390_s3 = sshll.u32 %s4792_s0, 4  ;;  %s4391_s3 = int_to_ptr.vmem [resolvable:$false] %s4390_s3 }
 0x108   : > { %s4392_s19 = scalar_lea.vmem %s4391_s3, 32  ;;  %p4393_p0 = scmp.lt.s32.totalorder %s857_s30, %s4391_s3 }
 0x109   : > { %p4388_p7 = pnand %p4386_p11, %p5048_p13  ;;  %p4394_p2 = scmp.lt.s32.totalorder %s4392_s19, %s4385_s7 }
 0x10b   : > { %p4389_p9 = pneg %p4388_p7  ;;  %p4395_p8 = por %p4394_p2, %p4393_p0 }
 0x10d   : > { %p4396_p6 = pnand %p4395_p8, %p4389_p9 }
 0x10f   : > { %4399 = shalt.err (!%p4396_p6)
}
 0x110   : > { %p5999_p12 = scmp.ne.s32.totalorder %s5982_s29, 0  ;;  %s4793_s14 = smov [#allocation3]  }
 0x111   : > { %s583_s10 = sshll.u32 %s4793_s14, 4  ;;  %s4794_s26 = smov [#allocation8]   ;;  %s584_s10 = int_to_ptr.vmem [resolvable:$true] %s583_s10 }
 0x112   : > { %3899 = dma.hbm_to_vmem [thread:$0]  (!%p5999_p12), %s5219_s8, 16, %s857_s30, %s5956_s12  }
 0x113   : > { %s615_s24 = sshll.u32 %s4794_s26, 4  ;;  %s6000_s5 = sld [smem:[#allocation49_spill]]  ;;  %s616_s24 = int_to_ptr.vmem [resolvable:$true] %s615_s24 }
 0x114   : > { %p6001_p10 = scmp.ne.s32.totalorder %s5984_s21, 0 }
 0x119   : > { %s4400_s3 = scalar_lea.hbm %s6000_s5, 128 }
 0x11a   : > { %p4401_p8 = scmp.ne.s32.totalorder %s6000_s5, %s4400_s3  ;;  %p4407_p5 = scmp.lt.u32.totalorder %s4400_s3, %s6000_s5 }
 0x11c   : > { %p4403_p3 = pnand %p4401_p8, %p6001_p10 }
 0x11e   : > { %p4404_p4 = pneg %p4403_p3 }
 0x120   : > { %p4409_p1 = pnand %p4407_p5, %p4404_p4 }
 0x122   : > { %4412 = shalt.err (!%p4409_p1)
}
 0x123   : > { %s4413_s8 = scalar_lea.vmem %s584_s10, 128  ;;  %p4421_p0 = scmp.lt.s32.totalorder %s584_s10, %s584_s10 }
 0x124   : > { %p4414_p11 = scmp.ne.s32.totalorder %s584_s10, %s4413_s8  ;;  %p4422_p2 = scmp.lt.s32.totalorder %s4413_s8, %s4413_s8 }
 0x126   : > { %p4416_p7 = pnand %p4414_p11, %p6001_p10  ;;  %p4423_p6 = por %p4422_p2, %p4421_p0 }
 0x128   : > { %p4417_p9 = pneg %p4416_p7 }
 0x12a   : > { %p4424_p12 = pnand %p4423_p6, %p4417_p9 }
 0x12c   : > { %4427 = shalt.err (!%p4424_p12)
}
 0x12d   : > { %p6002_p8 = scmp.ne.s32.totalorder %s5981_s27, 0  ;;  %s6003_s26 = sld [smem:[#allocation51_spill]] }
 0x12f   : > { %3853 = dma.hbm_to_vmem [thread:$0]  (!%p6002_p8), %s6000_s5, 128, %s584_s10, [#allocation4], %s5994_s23, %s5994_s23, %s5993_s20  }
 0x133   : > { %s4428_s15 = scalar_lea.hbm %s6003_s26, 32 }
 0x134   : > { %p4429_p3 = scmp.ne.s32.totalorder %s6003_s26, %s4428_s15  ;;  %p4435_p5 = scmp.lt.u32.totalorder %s4428_s15, %s6003_s26 }
 0x136   : > { %p4431_p12 = pnand %p4429_p3, %p6001_p10 }
 0x138   : > { %p4432_p4 = pneg %p4431_p12 }
 0x13a   : > { %p4437_p1 = pnand %p4435_p5, %p4432_p4 }
 0x13c   : > { %4440 = shalt.err (!%p4437_p1)
}
 0x13d   : > { %s4441_s8 = scalar_lea.vmem %s616_s24, 32  ;;  %p4449_p0 = scmp.lt.s32.totalorder %s616_s24, %s616_s24 }
 0x13e   : > { %p4442_p11 = scmp.ne.s32.totalorder %s616_s24, %s4441_s8  ;;  %p4450_p2 = scmp.lt.s32.totalorder %s4441_s8, %s4441_s8 }
 0x140   : > { %p4444_p7 = pnand %p4442_p11, %p6001_p10  ;;  %p4451_p6 = por %p4450_p2, %p4449_p0 }
 0x142   : > { %p4445_p9 = pneg %p4444_p7 }
 0x144   : > { %p4452_p13 = pnand %p4451_p6, %p4445_p9 }
 0x146   : > { %4455 = shalt.err (!%p4452_p13)
}
 0x147   : > { %3859 = dma.hbm_to_vmem [thread:$0]  (!%p6002_p8), %s6003_s26, 32, %s616_s24, [#allocation7]  }
 0x148   : > { %s4795_s10 = smov [#allocation29]   ;;  %s3798_s17 = smul.u32 3, %s4968_s28 }
 0x149   : > { %s639_s9 = sshll.u32 %s4795_s10, 4  ;;  %s3799_s30 = smul.u32 48, %s4772_s1  ;;  %s640_s9 = int_to_ptr.vmem [resolvable:$true] %s639_s9 }
 0x14a   : > { %s4456_s0 = scalar_lea.hbm %s5909_s16, 16 }
 0x14b   : > { %p4457_p13 = scmp.ne.s32.totalorder %s5909_s16, %s4456_s0  ;;  %p4463_p4 = scmp.lt.u32.totalorder %s4456_s0, %s5909_s16 }
 0x14d   : > { %p4459_p3 = pnand %p4457_p13, %p6001_p10 }
 0x14f   : > { %p4460_p12 = pneg %p4459_p3 }
 0x151   : > { %p4465_p5 = pnand %p4463_p4, %p4460_p12 }
 0x153   : > { %4468 = shalt.err (!%p4465_p5)
}
 0x154   : > { %s4469_s24 = scalar_lea.vmem %s640_s9, 16  ;;  %s4476_s20 = scalar_lea.vmem %s640_s9, 32 }
 0x155   : > { %p4470_p1 = scmp.ne.s32.totalorder %s640_s9, %s4469_s24  ;;  %p4477_p9 = scmp.lt.s32.totalorder %s640_s9, %s640_s9 }
 0x156   : > { %p4478_p0 = scmp.lt.s32.totalorder %s4476_s20, %s4469_s24 }
 0x157   : > { %p4472_p11 = pnand %p4470_p1, %p6001_p10 }
 0x158   : > { %p4479_p2 = por %p4478_p0, %p4477_p9 }
 0x159   : > { %p4473_p7 = pneg %p4472_p11 }
 0x15b   : > { %p4480_p6 = pnand %p4479_p2, %p4473_p7 }
 0x15d   : > { %4483 = shalt.err (!%p4480_p6)
}
 0x15e   : > { %3865 = dma.hbm_to_vmem [thread:$0]  (!%p6002_p8), %s5909_s16, 16, %s640_s9, [#allocation28]  }
 0x15f   : > { %s6004_s4 = sld [smem:[#allocation53_spill]]  ;;  %s681_s0 = scalar_lea.vmem [#allocation11], %s3798_s17 }
 0x160   : > { %s689_s3 = sshll.u32 %s681_s0, 4  ;;  %s5310_s19 = scalar_lea.hbm %s5899_s6, %s5083_s2  ;;  %s690_s3 = int_to_ptr.vmem [resolvable:$true] %s689_s3 }
 0x161   : > { %p6005_p8 = scmp.ne.s32.totalorder %s5991_s18, 0 }
 0x165   : > { %s5304_s21 = scalar_lea.hbm %s6004_s4, %s3799_s30  ;;  %s4489_s24 = scalar_lea.hbm %s6004_s4, 96 }
 0x166   : > { %s4484_s8 = scalar_lea.hbm %s5304_s21, 48  ;;  %p4490_p12 = scmp.lt.u32.totalorder %s5304_s21, %s6004_s4 }
 0x167   : > { %p4485_p10 = scmp.ne.s32.totalorder %s5304_s21, %s4484_s8  ;;  %p4491_p4 = scmp.lt.u32.totalorder %s4489_s24, %s4484_s8 }
 0x168   : > { %p4493_p1 = scmp.lt.u32.totalorder %s4484_s8, %s5304_s21 }
 0x169   : > { %p4487_p13 = pnand %p4485_p10, %p6005_p8  ;;  %p4492_p5 = por %p4491_p4, %p4490_p12 }
 0x16b   : > { %p4488_p3 = pneg %p4487_p13  ;;  %p4494_p11 = por %p4493_p1, %p4492_p5 }
 0x16d   : > { %p4495_p7 = pnand %p4494_p11, %p4488_p3 }
 0x16f   : > { %4498 = shalt.err (!%p4495_p7)
}
 0x170   : > { %s4499_s17 = scalar_lea.vmem %s690_s3, 48  ;;  %s4796_s10 = smov [#allocation11]  }
 0x171   : > { %p4500_p9 = scmp.ne.s32.totalorder %s690_s3, %s4499_s17  ;;  %s4504_s14 = sshll.u32 %s4796_s10, 4  ;;  %s4505_s14 = int_to_ptr.vmem [resolvable:$false] %s4504_s14 }
 0x172   : > { %s4506_s15 = scalar_lea.vmem %s4505_s14, 96  ;;  %p4507_p6 = scmp.lt.s32.totalorder %s690_s3, %s4505_s14 }
 0x173   : > { %p4502_p0 = pnand %p4500_p9, %p6005_p8  ;;  %p4508_p10 = scmp.lt.s32.totalorder %s4506_s15, %s4499_s17 }
 0x175   : > { %p4503_p2 = pneg %p4502_p0  ;;  %p4509_p13 = por %p4508_p10, %p4507_p6 }
 0x177   : > { %p4510_p4 = pnand %p4509_p13, %p4503_p2 }
 0x179   : > { %4513 = shalt.err (!%p4510_p4)
}
 0x17a   : > { %p6006_p12 = scmp.ne.s32.totalorder %s5982_s29, 0  ;;  %s6007_s0 = scalar_lea.sflag [#allocation10], %s5023_s25 }
 0x17b   : > { %s720_s7 = scalar_lea.vmem [#allocation14], %s4968_s28  ;;  %s6008_s30 = sld [smem:[#allocation56_spill]] }
 0x17c   : > { %3872 = dma.hbm_to_vmem [thread:$0]  (!%p6006_p12), %s5304_s21, 48, %s690_s3, %s6007_s0  }
 0x17d   : > { %s727_s27 = sshll.u32 %s720_s7, 4  ;;  %s4514_s23 = scalar_lea.hbm %s5310_s19, 16  ;;  %s728_s27 = int_to_ptr.vmem [resolvable:$true] %s727_s27 }
 0x17e   : > { %p4515_p3 = scmp.ne.s32.totalorder %s5310_s19, %s4514_s23  ;;  %s4519_s14 = scalar_lea.hbm %s5899_s6, 32 }
 0x17f   : > { %p4520_p11 = scmp.lt.u32.totalorder %s5310_s19, %s5899_s6  ;;  %p4521_p7 = scmp.lt.u32.totalorder %s4519_s14, %s4514_s23 }
 0x180   : > { %p4517_p5 = pnand %p4515_p3, %p6005_p8  ;;  %p4523_p0 = scmp.lt.u32.totalorder %s4514_s23, %s5310_s19 }
 0x181   : > { %s6009_s24 = smov %s6008_s30  ;;  %s5336_s20 = scalar_lea.hbm %s6008_s30, %s5083_s2 }
 0x182   : > { %p4518_p1 = pneg %p4517_p5  ;;  %p4522_p9 = por %p4521_p7, %p4520_p11 }
 0x184   : > { %p4524_p2 = por %p4523_p0, %p4522_p9 }
 0x186   : > { %p4525_p6 = pnand %p4524_p2, %p4518_p1 }
 0x188   : > { %4528 = shalt.err (!%p4525_p6)
}
 0x189   : > { %s4529_s21 = scalar_lea.vmem %s728_s27, 16  ;;  %s4797_s3 = smov [#allocation14]  }
 0x18a   : > { %p4530_p10 = scmp.ne.s32.totalorder %s728_s27, %s4529_s21  ;;  %s4534_s0 = sshll.u32 %s4797_s3, 4  ;;  %s4535_s0 = int_to_ptr.vmem [resolvable:$false] %s4534_s0 }
 0x18b   : > { %s4536_s7 = scalar_lea.vmem %s4535_s0, 32  ;;  %p4537_p3 = scmp.lt.s32.totalorder %s728_s27, %s4535_s0 }
 0x18c   : > { %p4532_p13 = pnand %p4530_p10, %p6005_p8  ;;  %p4538_p5 = scmp.lt.s32.totalorder %s4536_s7, %s4529_s21 }
 0x18e   : > { %p4533_p4 = pneg %p4532_p13  ;;  %p4539_p12 = por %p4538_p5, %p4537_p3 }
 0x190   : > { %p4540_p7 = pnand %p4539_p12, %p4533_p4 }
 0x192   : > { %4543 = shalt.err (!%p4540_p7)
}
 0x193   : > { %p6010_p11 = scmp.ne.s32.totalorder %s5982_s29, 0  ;;  %s6011_s12 = scalar_lea.sflag [#allocation13], %s5023_s25 }
 0x194   : > { %s754_s8 = scalar_lea.vmem [#allocation17], %s4968_s28  ;;  %s3407_s30 = sshll.u32 %s4968_s28, 2 }
 0x195   : > { %3878 = dma.hbm_to_vmem [thread:$0]  (!%p6010_p11), %s5310_s19, 16, %s728_s27, %s6011_s12  }
 0x196   : > { %s761_s9 = sshll.u32 %s754_s8, 4  ;;  %s4544_s23 = scalar_lea.hbm %s5336_s20, 16  ;;  %s762_s9 = int_to_ptr.vmem [resolvable:$true] %s761_s9 }
 0x197   : > { %p4545_p12 = scmp.ne.s32.totalorder %s5336_s20, %s4544_s23  ;;  %s4549_s14 = scalar_lea.hbm %s6009_s24, 32 }
 0x198   : > { %p4550_p0 = scmp.lt.u32.totalorder %s5336_s20, %s6009_s24  ;;  %p4551_p2 = scmp.lt.u32.totalorder %s4549_s14, %s4544_s23 }
 0x199   : > { %p4547_p1 = pnand %p4545_p12, %p6005_p8  ;;  %p4553_p10 = scmp.lt.u32.totalorder %s4544_s23, %s5336_s20 }
 0x19a   : > { %p4552_p6 = por %p4551_p2, %p4550_p0 }
 0x19b   : > { %p4548_p9 = pneg %p4547_p1 }
 0x19c   : > { %p4554_p13 = por %p4553_p10, %p4552_p6 }
 0x19e   : > { %p4555_p4 = pnand %p4554_p13, %p4548_p9 }
 0x1a0   : > { %4558 = shalt.err (!%p4555_p4)
}
 0x1a1   : > { %s4559_s19 = scalar_lea.vmem %s762_s9, 16  ;;  %s4798_s27 = smov [#allocation17]  }
 0x1a2   : > { %p4560_p3 = scmp.ne.s32.totalorder %s762_s9, %s4559_s19  ;;  %s4564_s3 = sshll.u32 %s4798_s27, 4  ;;  %s4565_s3 = int_to_ptr.vmem [resolvable:$false] %s4564_s3 }
 0x1a3   : > { %s4566_s0 = scalar_lea.vmem %s4565_s3, 32  ;;  %p4567_p12 = scmp.lt.s32.totalorder %s762_s9, %s4565_s3 }
 0x1a4   : > { %p4562_p5 = pnand %p4560_p3, %p6005_p8  ;;  %p4568_p1 = scmp.lt.s32.totalorder %s4566_s0, %s4559_s19 }
 0x1a6   : > { %p4563_p7 = pneg %p4562_p5  ;;  %p4569_p11 = por %p4568_p1, %p4567_p12 }
 0x1a8   : > { %p4570_p0 = pnand %p4569_p11, %p4563_p7 }
 0x1aa   : > { %4573 = shalt.err (!%p4570_p0)
}
 0x1ab   : > { %p6012_p2 = scmp.ne.s32.totalorder %s5982_s29, 0  ;;  %s6013_s7 = scalar_lea.sflag [#allocation16], %s5023_s25 }
 0x1ac   : > { %s3566_s12 = sshll.u32 %s4772_s1, 6  ;;  %s793_s8 = scalar_lea.vmem [#allocation20], %s3407_s30 }
 0x1ad   : > { %3884 = dma.hbm_to_vmem [thread:$0]  (!%p6012_p2), %s5336_s20, 16, %s762_s9, %s6013_s7  }
 0x1ae   : > { %s801_s23 = sshll.u32 %s793_s8, 4  ;;  %s6014_s14 = sld [smem:[#allocation58_spill]]  ;;  %s802_s23 = int_to_ptr.vmem [resolvable:$true] %s801_s23 }
 0x1b4   : > { %s799_s15 = scalar_lea.hbm %s6014_s14, %s3566_s12  ;;  %s4579_s3 = scalar_lea.hbm %s6014_s14, 128 }
 0x1b5   : > { %s4574_s21 = scalar_lea.hbm %s799_s15, 64  ;;  %p4580_p10 = scmp.lt.u32.totalorder %s799_s15, %s6014_s14 }
 0x1b6   : > { %p4575_p11 = scmp.ne.s32.totalorder %s799_s15, %s4574_s21  ;;  %p4581_p13 = scmp.lt.u32.totalorder %s4579_s3, %s4574_s21 }
 0x1b7   : > { %p4583_p3 = scmp.lt.u32.totalorder %s4574_s21, %s799_s15 }
 0x1b8   : > { %p4577_p9 = pnand %p4575_p11, %p6005_p8  ;;  %p4582_p4 = por %p4581_p13, %p4580_p10 }
 0x1ba   : > { %p4578_p6 = pneg %p4577_p9  ;;  %p4584_p5 = por %p4583_p3, %p4582_p4 }
 0x1bc   : > { %p4585_p7 = pnand %p4584_p5, %p4578_p6 }
 0x1be   : > { %4588 = shalt.err (!%p4585_p7)
}
 0x1bf   : > { %s4589_s9 = scalar_lea.vmem %s802_s23, 64  ;;  %s4799_s30 = smov [#allocation20]  }
 0x1c0   : > { %p4590_p12 = scmp.ne.s32.totalorder %s802_s23, %s4589_s9  ;;  %s4594_s7 = sshll.u32 %s4799_s30, 4  ;;  %s4595_s7 = int_to_ptr.vmem [resolvable:$false] %s4594_s7 }
 0x1c1   : > { %s4596_s12 = scalar_lea.vmem %s4595_s7, 128  ;;  %p4597_p11 = scmp.lt.s32.totalorder %s802_s23, %s4595_s7 }
 0x1c2   : > { %p4592_p1 = pnand %p4590_p12, %p6005_p8  ;;  %p4598_p9 = scmp.lt.s32.totalorder %s4596_s12, %s4589_s9 }
 0x1c4   : > { %p4593_p0 = pneg %p4592_p1  ;;  %p4599_p2 = por %p4598_p9, %p4597_p11 }
 0x1c6   : > { %p4600_p10 = pnand %p4599_p2, %p4593_p0 }
 0x1c8   : > { %4603 = shalt.err (!%p4600_p10)
}
 0x1c9   : > { %p6015_p13 = scmp.ne.s32.totalorder %s5982_s29, 0  ;;  %s6016_s8 = scalar_lea.sflag [#allocation19], %s5023_s25 }
 0x1ca   : > { %s6017_s21 = sld [smem:[#allocation59_spill]]  ;;  %s832_s3 = scalar_lea.vmem [#allocation23], %s4968_s28 }
 0x1cb   : > { %3890 = dma.hbm_to_vmem [thread:$0]  (!%p6015_p13), %s799_s15, 64, %s802_s23, %s6016_s8  }
 0x1cc   : > { %s839_s0 = sshll.u32 %s832_s3, 4  ;;  %s6019_s30 = sld [smem:[#allocation60_spill]]  ;;  %s840_s0 = int_to_ptr.vmem [resolvable:$true] %s839_s0 }
 0x1d0   : > { %s6018_s19 = smov %s6017_s21  ;;  %s5402_s27 = scalar_lea.hbm %s6017_s21, %s5083_s2 }
 0x1d1   : > { %s4604_s4 = scalar_lea.hbm %s5402_s27, 16  ;;  %s4609_s8 = scalar_lea.hbm %s6018_s19, 32 }
 0x1d2   : > { %s6020_s7 = smov %s6019_s30  ;;  %s5409_s12 = scalar_lea.hbm %s6019_s30, %s5083_s2 }
 0x1d3   : > { %p4605_p2 = scmp.ne.s32.totalorder %s5402_s27, %s4604_s4  ;;  %p4610_p3 = scmp.lt.u32.totalorder %s5402_s27, %s6018_s19 }
 0x1d4   : > { %p4611_p5 = scmp.lt.u32.totalorder %s4609_s8, %s4604_s4  ;;  %p4613_p12 = scmp.lt.u32.totalorder %s4604_s4, %s5402_s27 }
 0x1d5   : > { %p4607_p6 = pnand %p4605_p2, %p6005_p8 }
 0x1d6   : > { %p4612_p7 = por %p4611_p5, %p4610_p3 }
 0x1d7   : > { %p4608_p4 = pneg %p4607_p6 }
 0x1d8   : > { %p4614_p1 = por %p4613_p12, %p4612_p7 }
 0x1da   : > { %p4615_p0 = pnand %p4614_p1, %p4608_p4 }
 0x1dc   : > { %4618 = shalt.err (!%p4615_p0)
}
 0x1dd   : > { %s4619_s2 = scalar_lea.vmem %s840_s0, 16  ;;  %s4800_s21 = smov [#allocation23]  }
 0x1de   : > { %p4620_p11 = scmp.ne.s32.totalorder %s840_s0, %s4619_s2  ;;  %s4624_s3 = sshll.u32 %s4800_s21, 4  ;;  %s4625_s3 = int_to_ptr.vmem [resolvable:$false] %s4624_s3 }
 0x1df   : > { %s4626_s20 = scalar_lea.vmem %s4625_s3, 32  ;;  %p4627_p2 = scmp.lt.s32.totalorder %s840_s0, %s4625_s3 }
 0x1e0   : > { %p4622_p9 = pnand %p4620_p11, %p6005_p8  ;;  %p4628_p6 = scmp.lt.s32.totalorder %s4626_s20, %s4619_s2 }
 0x1e2   : > { %p4623_p10 = pneg %p4622_p9  ;;  %p4629_p13 = por %p4628_p6, %p4627_p2 }
 0x1e4   : > { %p4630_p3 = pnand %p4629_p13, %p4623_p10 }
 0x1e6   : > { %4633 = shalt.err (!%p4630_p3)
}
 0x1e7   : > { %p6021_p5 = scmp.ne.s32.totalorder %s5982_s29, 0  ;;  %s6022_s4 = scalar_lea.sflag [#allocation22], %s5023_s25 }
 0x1e8   : > { %s866_s9 = scalar_lea.vmem [#allocation26], %s4968_s28  ;;  %s4634_s23 = scalar_lea.hbm %s5409_s12, 16 }
 0x1e9   : > { %3896 = dma.hbm_to_vmem [thread:$0]  (!%p6021_p5), %s5402_s27, 16, %s840_s0, %s6022_s4  }
 0x1ea   : > { %s873_s30 = sshll.u32 %s866_s9, 4  ;;  %p4635_p4 = scmp.ne.s32.totalorder %s5409_s12, %s4634_s23  ;;  %s874_s30 = int_to_ptr.vmem [resolvable:$true] %s873_s30 }
 0x1eb   : > { %s4639_s17 = scalar_lea.hbm %s6020_s7, 32  ;;  %p4640_p12 = scmp.lt.u32.totalorder %s5409_s12, %s6020_s7 }
 0x1ec   : > { %p4637_p13 = pnand %p4635_p4, %p6005_p8  ;;  %p4641_p1 = scmp.lt.u32.totalorder %s4639_s17, %s4634_s23 }
 0x1ed   : > { %p4643_p11 = scmp.lt.u32.totalorder %s4634_s23, %s5409_s12 }
 0x1ee   : > { %p4638_p7 = pneg %p4637_p13  ;;  %p4642_p0 = por %p4641_p1, %p4640_p12 }
 0x1f0   : > { %p4644_p9 = por %p4643_p11, %p4642_p0 }
 0x1f2   : > { %p4645_p10 = pnand %p4644_p9, %p4638_p7 }
 0x1f4   : > { %4648 = shalt.err (!%p4645_p10)
}
 0x1f5   : > { %s4649_s28 = scalar_lea.vmem %s874_s30, 16  ;;  %s4801_s27 = smov [#allocation26]  }
 0x1f6   : > { %p4650_p2 = scmp.ne.s32.totalorder %s874_s30, %s4649_s28  ;;  %s4654_s0 = sshll.u32 %s4801_s27, 4  ;;  %s4655_s0 = int_to_ptr.vmem [resolvable:$false] %s4654_s0 }
 0x1f7   : > { %s4656_s21 = scalar_lea.vmem %s4655_s0, 32  ;;  %p4657_p4 = scmp.lt.s32.totalorder %s874_s30, %s4655_s0 }
 0x1f8   : > { %p4652_p6 = pnand %p4650_p2, %p6005_p8  ;;  %p4658_p13 = scmp.lt.s32.totalorder %s4656_s21, %s4649_s28 }
 0x1fa   : > { %p4653_p3 = pneg %p4652_p6  ;;  %p4659_p5 = por %p4658_p13, %p4657_p4 }
 0x1fc   : > { %p4660_p1 = pnand %p4659_p5, %p4653_p3 }
 0x1fe   : > { %4663 = shalt.err (!%p4660_p1)
}
 0x1ff   : > { %p6023_p12 = scmp.ne.s32.totalorder %s5982_s29, 0  ;;  %s6024_s3 = scalar_lea.sflag [#allocation25], %s5023_s25 }
 0x200   : > { %s6025_s20 = sld [smem:[#allocation46_spill]] }
 0x201   : > { %3902 = dma.hbm_to_vmem [thread:$0]  (!%p6023_p12), %s5409_s12, 16, %s874_s30, %s6024_s3  }
 0x206   : > { %p6026_p7 = scmp.ne.s32.totalorder %s6025_s20, 0 }
 0x207   : > { %s6027_s18 = sld [smem:[#allocation44_spill]] (!%p6026_p7) }
 0x208   : > { %882 = sbr.rel (%p6026_p7) target bundleno = 3636 (0xe34), region = 96 }
 0x20d   : > { %p6028_p8 = scmp.eq.s32.totalorder (!%p6026_p7), %s6027_s18, 0 }
 0x20f   : > { %4715 = dma.done.wait (%p6028_p8), [#allocation4], 128   ;;  %p6029_p0 = pmov %p6028_p8 }
 0x211   : > { %4717 = vsyncadd (%p6029_p0), [#allocation4], 4294967168  ;;  %p6030_p11 = pmov %p6029_p0 }
 0x212   : > { %p6031_p5 = pmov %p6029_p0 }
 0x213   : > { %4719 = dma.done.wait (%p6030_p11), [#allocation7], 96  }
 0x214   : > { %4721 = vsyncadd (%p6031_p5), [#allocation7], 4294967200  ;;  %s6032_s29 = sld [smem:[#allocation41_spill]]  ;;  %s6033_s25 = sld [smem:[#allocation45_spill]] }
 0x215   : > { %s5461_s4 = sand.u32 1, %s6027_s18  }
 0x216   : > { %s897_s30 = scalar_lea.sflag [#allocation10], %s5461_s4 }
 0x21a   : > { %s5464_s12 = sand.u32 1, %s6032_s29   ;;  %p6034_p9 = scmp.ne.s32.totalorder %s6033_s25, 0 }
 0x21b   : > { %s3800_s9 = smul.u32 192, %s5464_s12 }
 0x21d   : > { %s5468_s23 = scalar_lea.vmem [#allocation9], %s3800_s9 }
 0x21e   : > { %4723 = dma.done.wait (%p6034_p9), %s897_s30, 3120  }
 0x21f   : > { %4725 = vsyncadd (%p6034_p9), %s897_s30, 4294964176  ;;  %s3801_s15 = smul.u32 3, %s5464_s12  ;;  %s3420_s8 = sshll.u32 %s5464_s12, 6 }
 0x220   : > { %s915_s10 = scalar_lea.sflag [#allocation13], %s5461_s4  ;;  %s5479_s2 = scalar_lea.vmem [#allocation12], %s3420_s8 }
 0x221   : > { %s5476_s17 = scalar_lea.vmem [#allocation11], %s3801_s15 }
 0x222   : > { %4727 = dma.done.wait (%p6034_p9), %s915_s10, 1040  }
 0x223   : > { %4729 = vsyncadd (%p6034_p9), %s915_s10, 4294966256  ;;  %s926_s28 = scalar_lea.vmem [#allocation14], %s5464_s12  ;;  %s932_s27 = scalar_lea.sflag [#allocation16], %s5461_s4 }
 0x224   : > { %s934_s0 = scalar_lea.vmem [#allocation15], %s5464_s12 }
 0x225   : > { %4731 = dma.done.wait (%p6034_p9), %s932_s27, 32  }
 0x226   : > { %4733 = vsyncadd (%p6034_p9), %s932_s27, 4294967264  ;;  %s3421_s21 = sshll.u32 %s5464_s12, 8  ;;  %s942_s3 = scalar_lea.vmem [#allocation17], %s5464_s12 }
 0x227   : > { %s948_s20 = scalar_lea.sflag [#allocation19], %s5461_s4  ;;  %s5495_s29 = scalar_lea.vmem [#allocation18], %s3421_s21 }
 0x228   : > { %4735 = dma.done.wait (%p6034_p9), %s948_s20, 4160  }
 0x229   : > { %4737 = vsyncadd (%p6034_p9), %s948_s20, 4294963136  ;;  %s3422_s9 = sshll.u32 %s5464_s12, 2  ;;  %s966_s15 = scalar_lea.sflag [#allocation22], %s5461_s4 }
 0x22a   : > { %s5502_s30 = scalar_lea.vmem [#allocation20], %s3422_s9  ;;  %s5505_s8 = scalar_lea.vmem [#allocation21], %s3421_s21 }
 0x22b   : > { %4739 = dma.done.wait (%p6034_p9), %s966_s15, 4112  }
 0x22c   : > { %4741 = vsyncadd (%p6034_p9), %s966_s15, 4294963184  ;;  %s977_s10 = scalar_lea.vmem [#allocation23], %s5464_s12  ;;  %s983_s27 = scalar_lea.sflag [#allocation25], %s5461_s4 }
 0x22d   : > { %s985_s20 = scalar_lea.vmem [#allocation24], %s5464_s12 }
 0x22e   : > { %4743 = dma.done.wait (%p6034_p9), %s983_s27, 32  }
 0x22f   : > { %4745 = vsyncadd (%p6034_p9), %s983_s27, 4294967264  ;;  %s993_s21 = scalar_lea.vmem [#allocation26], %s5464_s12  ;;  %p6035_p10 = pmov %p6029_p0 }
 0x230   : > { %p6036_p2 = pmov %p6029_p0 }
 0x231   : > { %4747 = dma.done.wait (%p6035_p10), [#allocation28], 1040  }
 0x232   : > { %4749 = vsyncadd (%p6036_p2), [#allocation28], 4294966256  ;;  %s6037_s9 = sld [smem:[#allocation43_spill]] }
 0x238   : > { %p3426_p6 = scmp.ne.s32.totalorder %s6037_s9, 0 }
 0x239   : > { %v3569_v0 = vld [vmem:[#allocation3] sm:$0xff] (!%p3426_p6)  }
 0x23a   : > { %1106 = sbr.rel (%p3426_p6) target bundleno = 577 (0x241), region = 168  ;;  %v3570_v1 = vunpack.c.l.bf16 (!%p3426_p6), %v3569_v0  ;;  %v3571_v2 = vunpack.c.h.bf16 (!%p3426_p6), %v3569_v0 }
 0x23c   : > { %1111 = vst [vmem:[#allocation2] sm:$0xff] (!%p3426_p6), %v3570_v1  ;;  %1112 = vst [vmem:[#allocation2 + $0x8] sm:$0xff] (!%p3426_p6), %v3571_v2 }
 0x241 PF: > { %v3988_v3 = vld [vmem:[%s5468_s23 + $0x4] ss:$12 sps:$4 sm:$0xff]   ;;  %v3990_v4 = vld [vmem:[%s5468_s23] ss:$12 sps:$4 sm:$0xff]   ;;  %v4802_v5 = vmov 0   ;;  %v4803_v6 = vmov 0.0   ;;  %v1150_v32 = vlaneseq }
 0x242   : > { %1325 = vmatprep.mubr.bf16.mxu0 %v4802_v5  ;;  %3668 = vmatprep.subr.bf16.mxu1 %v4803_v6  ;;  %v3991_v7 = vld [vmem:[%s5468_s23 + $0x1c] ss:$12 sps:$4 sm:$0xff]   ;;  %v3993_v8 = vld [vmem:[%s5468_s23 + $0x18] ss:$12 sps:$4 sm:$0xff]   ;;  %v3994_v9 = vld [vmem:[%s5468_s23 + $0x34] ss:$12 sps:$4 sm:$0xff]  }
 0x243   : > { %1293 = vmatprep.subr.bf16.mxu0 %v3988_v3  ;;  %v3996_v10 = vld [vmem:[%s5468_s23 + $0x30] ss:$12 sps:$4 sm:$0xff]   ;;  %v3997_v11 = vld [vmem:[%s5468_s23 + $0x4c] ss:$12 sps:$4 sm:$0xff]   ;;  %v3999_v12 = vld [vmem:[%s5468_s23 + $0x48] ss:$12 sps:$4 sm:$0xff]  }
 0x244   : > { %1294 = vmatpush1.bf16.msra.mxu0 %v3990_v4  ;;  %v4000_v13 = vld [vmem:[%s5468_s23 + $0x64] ss:$12 sps:$4 sm:$0xff]   ;;  %v4012_v14 = vld [vmem:[%s5468_s23 + $0x8] ss:$12 sps:$4 sm:$0xff]   ;;  %v4013_v15 = vld [vmem:[%s5468_s23 + $0x20] ss:$12 sps:$4 sm:$0xff]  }
 0x245   : > { %1295 = vmatprep.subr.bf16.mxu0 %v3991_v7  ;;  %3669 = vmatpush3.bf16.msra.mxu1 %v4012_v14  ;;  %v4002_v16 = vld [vmem:[%s5468_s23 + $0x60] ss:$12 sps:$4 sm:$0xff]   ;;  %v4003_v17 = vld [vmem:[%s5468_s23 + $0x7c] ss:$12 sps:$4 sm:$0xff]   ;;  %v4014_v18 = vld [vmem:[%s5468_s23 + $0x38] ss:$12 sps:$4 sm:$0xff]  }
 0x246   : > { %3670 = vmatprep.subr.bf16.mxu1 %v4803_v6  ;;  %v4005_v19 = vld [vmem:[%s5468_s23 + $0x78] ss:$12 sps:$4 sm:$0xff]   ;;  %v4006_v20 = vld [vmem:[%s5468_s23 + $0x94] ss:$12 sps:$4 sm:$0xff]   ;;  %v4015_v21 = vld [vmem:[%s5468_s23 + $0x50] ss:$12 sps:$4 sm:$0xff]  }
 0x247   : > { %v4008_v22 = vld [vmem:[%s5468_s23 + $0x90] ss:$12 sps:$4 sm:$0xff]   ;;  %v4009_v23 = vld [vmem:[%s5468_s23 + $0xac] ss:$12 sps:$4 sm:$0xff]   ;;  %v4016_v24 = vld [vmem:[%s5468_s23 + $0x68] ss:$12 sps:$4 sm:$0xff]  }
 0x248   : > { %1296 = vmatpush1.bf16.msra.mxu0 %v3993_v8  ;;  %v4011_v25 = vld [vmem:[%s5468_s23 + $0xa8] ss:$12 sps:$4 sm:$0xff]   ;;  %v4017_v28 = vld [vmem:[%s5468_s23 + $0x80] ss:$12 sps:$4 sm:$0xff]   ;;  %v4018_v30 = vld [vmem:[%s5468_s23 + $0x98] ss:$12 sps:$4 sm:$0xff]  }
 0x249   : > { %1297 = vmatprep.subr.bf16.mxu0 %v3994_v9  ;;  %3671 = vmatpush3.bf16.msra.mxu1 %v4013_v15  ;;  %v5550_v26 = vld [vmem:[#allocation2] sm:$0xff]  ;;  %v5552_v27 = vld [vmem:[#allocation2 + $0x8] sm:$0xff]  ;;  %vm4804_vm0 = vmmov 0   ;;  %v5571_v33 = vshrl.u32 %v1150_v32, 7  ;;  %vm1445_vm1 = vcmask 523264   ;;  %s4805_s18 = smov 64  }
 0x24a   : > { %3672 = vmatprep.subr.bf16.mxu1 %v4803_v6  ;;  %v1115_v29 = vpack.c.bf16 %v5552_v27, %v5550_v26  ;;  %v4019_v31 = vld [vmem:[%s5468_s23 + $0xb0] ss:$12 sps:$4 sm:$0xff]   ;;  %3684 = vmatprep.mubr.msk.bf16.mxu1 %vm4804_vm0, %v4803_v6  ;;  %v1148_v35 = vld [vmem:[%s5476_s17] sm:$0x7]  ;;  %vm1682_vm2 = vcmask 1043456   ;;  %vm1630_vm3 = vcmask 64512  }
 0x24b   : > { %v1156_v34 = vsub.s32 1, %v5571_v33  ;;  %v1152_v36 = vsub.s32 0, %v5571_v33  ;;  %v1160_v51 = vsub.s32 2, %v5571_v33  ;;  %s6038_s25 = sld [smem:[#allocation43_spill]] }
 0x24c   : > { %1298 = vmatpush1.bf16.msra.mxu0 %v3996_v10 }
 0x24d   : > { %1299 = vmatprep.subr.bf16.mxu0 %v3997_v11  ;;  %3673 = vmatpush3.bf16.msra.mxu1 %v4014_v18  ;;  %v1157_v37 = vrot.slane %v1148_v35, %v1156_v34  ;;  %v1153_v38 = vrot.slane %v1148_v35, %v1152_v36  ;;  %v1161_v52 = vrot.slane %v1148_v35, %v1160_v51 }
 0x24e   : > { %3674 = vmatprep.subr.bf16.mxu1 %v4803_v6 }
 0x250   : > { %1300 = vmatpush1.bf16.msra.mxu0 %v3999_v12 }
 0x251   : > { %1301 = vmatprep.subr.bf16.mxu0 %v4000_v13  ;;  %3675 = vmatpush3.bf16.msra.mxu1 %v4015_v21  ;;  %p3541_p3 = scmp.ne.s32.totalorder %s6038_s25, 1 }
 0x252   : > { %3676 = vmatprep.subr.bf16.mxu1 %v4803_v6  ;;  %vm4807_vm4 = vmmov (!%p3541_p3), 0   ;;  %s6039_s23 = sld [smem:[#allocation62_spill]] (!%p3541_p3)  ;;  %vm2839_vm5 = vcmask (!%p3541_p3), 1041409   ;;  %s6040_s4 = sld [smem:[#allocation63_spill]] (!%p3541_p3) }
 0x254   : > { %1302 = vmatpush1.bf16.msra.mxu0 %v4002_v16 }
 0x255   : > { %1303 = vmatprep.subr.bf16.mxu0 %v4003_v17  ;;  %3677 = vmatpush3.bf16.msra.mxu1 %v4016_v24 }
 0x256   : > { %3678 = vmatprep.subr.bf16.mxu1 %v4803_v6 }
 0x258   : > { %1304 = vmatpush1.bf16.msra.mxu0 %v4005_v19  ;;  %v3452_v19 = vld [vmem:[#allocation6 + $0x1] ss:$0 sm:$0xff] }
 0x259   : > { %1305 = vmatprep.subr.bf16.mxu0 %v4006_v20  ;;  %3679 = vmatpush3.bf16.msra.mxu1 %v4017_v28  ;;  %v3451_v20 = vld [vmem:[#allocation6] ss:$0 sm:$0xff] }
 0x25a   : > { %3680 = vmatprep.subr.bf16.mxu1 %v4803_v6 }
 0x25c   : > { %1306 = vmatpush1.bf16.msra.mxu0 %v4008_v22 }
 0x25d   : > { %1307 = vmatprep.subr.bf16.mxu0 %v4009_v23  ;;  %3681 = vmatpush3.bf16.msra.mxu1 %v4018_v30  ;;  %v3453_v30 = vld [vmem:[#allocation6 + $0x2] ss:$0 sm:$0xff] }
 0x25e   : > { %3682 = vmatprep.subr.bf16.mxu1 %v4803_v6 }
 0x260   : > { %1308 = vmatpush1.bf16.msra.mxu0 %v4011_v25 }
 0x261   : > { %3712 = vmatprep.subr.bf16.mxu0 %v4803_v6  ;;  %3683 = vmatpush3.bf16.msra.mxu1 %v4019_v31 }
 0x262   : > { %3688 = vmatprep.subr.bf16.mxu1 %v4803_v6 }
 0x263   : > { %1326 = vmatmul.mubr.bf16.vlgmr.msra.gmra.mrb[0].mxu0 %v1115_v29 }
 0x264   : > { %3714 = vmatprep.mubr.msk.bf16.mxu0 %vm4804_vm0, %v4803_v6  ;;  %3685 = vmatmul.mubr.bf16.vlgmr.msra.gmra.mrb[0].mxu1 %v1115_v29 }
 0x265   : > { %3690 = vmatprep.mubr.msk.bf16.mxu1 %vm4804_vm0, %v4803_v6 }
 0x336   : > { %v1327_v39 = vpop.f32.mrb[0].mxu0 }
 0x337   : > { %v1329_v40 = vpop.f32.mrb[1].mxu0  ;;  %v1328_v44 = vadd.f32 %v1327_v39, %v1153_v38  ;;  %v1370_v53 = vpop.f32.mrb[0].mxu1 }
 0x338   : > { %v1330_v41 = vadd.f32 %v1329_v40, %v1157_v37  ;;  %v1331_v42 = vpop.f32.mrb[2].mxu0  ;;  %v3686_v54 = vpop.f32.mrb[1].mxu1  ;;  %v5594_v58 = vadd.f32 %v1370_v53, %v1161_v52 }
 0x339   : > { %v1333_v43 = vpop.f32.mrb[3].mxu0  ;;  %v1385_v48 = vmul.f32 0.125, %v1328_v44  ;;  %v1332_v49 = vadd.f32 %v1331_v42, %v1153_v38  ;;  %v1373_v55 = vpop.f32.mrb[2].mxu1 }
 0x33a   : > { %v1409_v45 = vpack.c.bf16 %v1330_v41, %v1330_v41  ;;  %v1334_v46 = vadd.f32 %v1333_v43, %v1157_v37  ;;  %1391 = vrot.lane.b32.xlu0 %v1330_v41, %s4805_s18  ;;  %v5592_v56 = vadd.f32 %v1373_v55, %v1161_v52  ;;  %v3687_v57 = vpop.f32.mrb[3].mxu1  ;;  %v1413_v59 = vpack.c.bf16 %v5594_v58, %v5594_v58  ;;  %v3454_v41 = vld [vmem:[#allocation6 + $0x3] ss:$0 sm:$0xff] }
 0x33b   : > { %v1405_v50 = vpack.c.bf16 %v1385_v48, %v1385_v48  ;;  %v1387_v8 = vmul.f32 0.125, %v1332_v49 }
 0x33c   : > { %1393 = vrot.lane.b32.xlu1 %v1334_v46, %s4805_s18  ;;  %v1450_v47 = vsel %vm1445_vm1, %v1409_v45, 0  ;;  %v1684_v60 = vsel %vm1682_vm2, %v1413_v59, 0  ;;  %v1411_v2 = vpack.c.bf16 %v1334_v46, %v1334_v46 }
 0x33d   : > { %3689 = vmatpush3.bf16.xpose.msra.mxu1 %v1450_v47  ;;  %3713 = vmatpush3.bf16.msra.mxu0 %v1684_v60  ;;  %v1407_v10 = vpack.c.bf16 %v1387_v8, %v1387_v8 }
 0x33e   : > { %1379 = vrot.lane.b32.xlu0 %v1328_v44, %s4805_s18  ;;  %3694 = vmatprep.subr.bf16.mxu1 %v4803_v6  ;;  %v1542_v4 = vsel %vm1445_vm1, %v1411_v2, 0 }
 0x33f   : > { %3724 = vmatprep.subr.bf16.mxu0 %v4803_v6 }
 0x340   : > { %1381 = vrot.lane.b32.xlu1 %v1332_v49, %s4805_s18 }
 0x344   : > { %3691 = vmatmul.mubr.msk.bf16.vlgmr.msra.gmra.mrb[4].mxu1 %vm1445_vm1, %v1405_v50 }
 0x345   : > { %3696 = vmatprep.mubr.msk.bf16.mxu1 %vm4804_vm0, %v4803_v6 }
 0x3ac   : > { %v1392_v61 = vpop.permute.xlu0 %1391 }
 0x3ad   : > { %v1410_v62 = vpack.c.bf16 %v1392_v61, %v1392_v61 }
 0x3ae   : > { %v1394_v7 = vpop.permute.xlu1 %1393 }
 0x3af   : > { %v1496_v63 = vsel %vm1445_vm1, %v1410_v62, 0  ;;  %v1412_v9 = vpack.c.bf16 %v1394_v7, %v1394_v7 }
 0x3b0   : > { %v1380_v0 = vpop.permute.xlu0 %1379  ;;  %3695 = vmatpush3.bf16.xpose.msra.mxu1 %v1496_v63 }
 0x3b1   : > { %v1386_v1 = vmul.f32 0.125, %v1380_v0  ;;  %3700 = vmatprep.subr.bf16.mxu1 %v4803_v6  ;;  %v1588_v12 = vsel %vm1445_vm1, %v1412_v9, 0 }
 0x3b2   : > { %v1382_v11 = vpop.permute.xlu1 %1381 }
 0x3b3   : > { %v1406_v3 = vpack.c.bf16 %v1386_v1, %v1386_v1  ;;  %v1388_v13 = vmul.f32 0.125, %v1382_v11 }
 0x3b5   : > { %v1408_v14 = vpack.c.bf16 %v1388_v13, %v1388_v13 }
 0x3b7   : > { %3697 = vmatmul.mubr.msk.bf16.vlgmr.msra.gmra.mrb[8].mxu1 %vm1445_vm1, %v1406_v3 }
 0x3b8   : > { %3701 = vmatpush3.bf16.xpose.msra.mxu1 %v1542_v4  ;;  %3702 = vmatprep.mubr.msk.bf16.mxu1 %vm4804_vm0, %v4803_v6 }
 0x3b9   : > { %3706 = vmatprep.subr.bf16.mxu1 %v4803_v6 }
 0x3bf   : > { %3703 = vmatmul.mubr.msk.bf16.vlgmr.msra.gmra.mrb[12].mxu1 %vm1445_vm1, %v1407_v10 }
 0x3c0   : > { %3707 = vmatpush3.bf16.xpose.msra.mxu1 %v1588_v12  ;;  %3708 = vmatprep.mubr.msk.bf16.mxu1 %vm4804_vm0, %v4803_v6 }
 0x3c1   : > { %3718 = vmatprep.subr.bf16.mxu1 %v4803_v6 }
 0x3c7   : > { %3709 = vmatmul.mubr.msk.bf16.vlgmr.msra.gmra.mrb[16].mxu1 %vm1445_vm1, %v1408_v14 }
 0x3c8   : > { %3720 = vmatprep.mubr.msk.bf16.mxu1 %vm4804_vm0, %v4803_v6 }
 0x417   : > { %v1486_v15 = vpop.f32.mrb[4].mxu1 }
 0x418   : > { %v3692_v16 = vpop.f32.mrb[5].mxu1  ;;  %v1487_v25 = vadd.f32 %v3451_v20, %v1486_v15 }
 0x419   : > { %v1489_v17 = vpop.f32.mrb[6].mxu1 }
 0x41a   : > { %v3693_v18 = vpop.f32.mrb[7].mxu1  ;;  %v1631_v31 = vsel %vm1630_vm3, %v1487_v25, -inf }
 0x48a   : > { %v1532_v21 = vpop.f32.mrb[8].mxu1 }
 0x48b   : > { %v1533_v22 = vadd.f32 %v3452_v19, %v1532_v21  ;;  %v3698_v23 = vpop.f32.mrb[9].mxu1 }
 0x48c   : > { %v1535_v24 = vpop.f32.mrb[10].mxu1 }
 0x48d   : > { %v3699_v28 = vpop.f32.mrb[11].mxu1  ;;  %v1634_v29 = vsel %vm1630_vm3, %v1533_v22, -inf  ;;  %v1415_v24 = vpack.c.bf16 %v5592_v56, %v5592_v56 }
 0x48e   : > { %1635 = vmax.xlane.f32.xlu0 %v1634_v29 }
 0x492   : > { %1632 = vmax.xlane.f32.xlu0 %v1631_v31  ;;  %v1578_v32 = vpop.f32.mrb[12].mxu1 }
 0x493   : > { %v1579_v35 = vadd.f32 %v3453_v30, %v1578_v32  ;;  %v3704_v37 = vpop.f32.mrb[13].mxu1  ;;  %v1776_v30 = vsel %vm1682_vm2, %v1415_v24, 0 }
 0x494   : > { %v1581_v38 = vpop.f32.mrb[14].mxu1  ;;  %v4021_v37 = vld [vmem:[%s5479_s2 + $0x8] sm:$0xff]  }
 0x495   : > { %v3705_v39 = vpop.f32.mrb[15].mxu1  ;;  %v1637_v40 = vsel %vm1630_vm3, %v1579_v35, -inf  ;;  %v4022_v38 = vld [vmem:[%s5479_s2 + $0x10] sm:$0xff]  }
 0x496   : > { %1638 = vmax.xlane.f32.xlu0 %v1637_v40  ;;  %v4023_v39 = vld [vmem:[%s5479_s2 + $0x18] sm:$0xff]   ;;  %v4024_v40 = vld [vmem:[%s5479_s2 + $0x20] sm:$0xff]  }
 0x49a   : > { %v1624_v42 = vpop.f32.mrb[16].mxu1 }
 0x49b   : > { %v1625_v43 = vadd.f32 %v3454_v41, %v1624_v42  ;;  %v3710_v44 = vpop.f32.mrb[17].mxu1  ;;  %v4025_v41 = vld [vmem:[%s5479_s2 + $0x28] sm:$0xff]   ;;  %v4026_v42 = vld [vmem:[%s5479_s2 + $0x30] sm:$0xff]  }
 0x49c   : > { %v1627_v45 = vpop.f32.mrb[18].mxu1 }
 0x49d   : > { %v3711_v46 = vpop.f32.mrb[19].mxu1  ;;  %v1640_v47 = vsel %vm1630_vm3, %v1625_v43, -inf }
 0x49e   : > { %1641 = vmax.xlane.f32.xlu1 %v1640_v47  ;;  %v4027_v47 = vld [vmem:[%s5479_s2 + $0x38] sm:$0xff]  }
 0x51b   : > { %v1636_v48 = vpop.xlane.xlu0 %1635 }
 0x51c   : > { %v1644_v49 = vsub.f32 %v1533_v22, %v1636_v48 }
 0x51e   : > { %v1649_v50 = vmul.f32 1.442695, %v1644_v49 }
 0x51f   : > { %v1633_v61 = vpop.xlane.xlu0 %1632 }
 0x520   : > { %4108 = vpow2.f32 %v1649_v50  ;;  %v1643_v62 = vsub.f32 %v1487_v25, %v1633_v61 }
 0x522   : > { %v1647_v63 = vmul.f32 1.442695, %v1643_v62 }
 0x523   : > { %v1639_v0 = vpop.xlane.xlu0 %1638 }
 0x524   : > { %v1645_v1 = vsub.f32 %v1579_v35, %v1639_v0  ;;  %v4020_v35 = vld [vmem:[%s5479_s2] sm:$0xff]  }
 0x526   : > { %v1651_v3 = vmul.f32 1.442695, %v1645_v1 }
 0x52a   : > { %v4109_v52 = vpop.eup %4108 }
 0x52b   : > { %v1642_v53 = vpop.xlane.xlu1 %1641  ;;  %v1658_v54 = vsel %vm1630_vm3, %v4109_v52, 0.0 }
 0x52c   : > { %v1646_v55 = vsub.f32 %v1625_v43, %v1642_v53  ;;  %1659 = vadd.xlane.f32.xlu1 %v1658_v54 }
 0x52e   : > { %v1653_v57 = vmul.f32 1.442695, %v1646_v55 }
 0x530   : > { %4110 = vpow2.f32 %v1653_v57 }
 0x531   : > { %4112 = vpow2.f32 %v1647_v63 }
 0x532   : > { %4114 = vpow2.f32 %v1651_v3 }
 0x53a   : > { %v4111_v59 = vpop.eup %4110 }
 0x53b   : > { %v1664_v60 = vsel %vm1630_vm3, %v4111_v59, 0.0  ;;  %v4113_v2 = vpop.eup %4112 }
 0x53c   : > { %1665 = vadd.xlane.f32.xlu0 %v1664_v60  ;;  %v1655_v4 = vsel %vm1630_vm3, %v4113_v2, 0.0  ;;  %v4115_v7 = vpop.eup %4114 }
 0x53d   : > { %1399 = vrot.lane.b32.xlu1 %v5594_v58, %s4805_s18  ;;  %v1661_v8 = vsel %vm1630_vm3, %v4115_v7, 0.0 }
 0x552   : > { %1401 = vrot.lane.b32.xlu0 %v5592_v56, %s4805_s18 }
 0x561   : > { %1656 = vadd.xlane.f32.xlu1 %v1655_v4 }
 0x571   : > { %1662 = vadd.xlane.f32.xlu0 %v1661_v8 }
 0x5b9   : > { %v1660_v58 = vpop.xlane.xlu1 %1659 }
 0x5ba   : > { %4116 = vrcp.f32 %v1660_v58 }
 0x5bd   : > { %v1400_v9 = vpop.permute.xlu1 %1399 }
 0x5be   : > { %v1414_v10 = vpack.c.bf16 %v1400_v9, %v1400_v9 }
 0x5c0   : > { %v1730_v11 = vsel %vm1682_vm2, %v1414_v10, 0 }
 0x5c1   : > { %3719 = vmatpush3.bf16.msra.mxu1 %v1730_v11 }
 0x5c2   : > { %3730 = vmatprep.subr.bf16.mxu1 %v4803_v6 }
 0x5c4   : > { %v4117_v12 = vpop.eup %4116 }
 0x5c5   : > { %v1672_v13 = vmul.f32 %v4117_v12, %v4109_v52 }
 0x5c7   : > { %v1676_v14 = vpack.c.bf16 %v1672_v13, %v1672_v13 }
 0x5c9   : > { %v1666_v15 = vpop.xlane.xlu0 %1665  ;;  %3721 = vmatmul.mubr.msk.bf16.vlgmr.msra.gmra.mrb[20].mxu1 %vm1630_vm3, %v1676_v14 }
 0x5ca   : > { %4118 = vrcp.f32 %v1666_v15  ;;  %3732 = vmatprep.mubr.msk.bf16.mxu1 %vm4804_vm0, %v4803_v6  ;;  %v4028_v15 = vld [vmem:[%s5495_s29] ss:$16 sps:$4 sm:$0xff]  }
 0x5cd   : > { %v1402_v16 = vpop.permute.xlu0 %1401 }
 0x5ce   : > { %v1416_v17 = vpack.c.bf16 %v1402_v16, %v1402_v16  ;;  %v4031_v16 = vld [vmem:[%s5495_s29 + $0x8] ss:$16 sps:$4 sm:$0xff]  }
 0x5d0   : > { %v1822_v18 = vsel %vm1682_vm2, %v1416_v17, 0  ;;  %v4033_v17 = vld [vmem:[%s5495_s29 + $0xc] ss:$16 sps:$4 sm:$0xff]  }
 0x5d1   : > { %3731 = vmatpush3.bf16.msra.mxu1 %v1822_v18  ;;  %v4036_v18 = vld [vmem:[%s5495_s29 + $0x24] ss:$16 sps:$4 sm:$0xff]  }
 0x5d4   : > { %v4119_v19 = vpop.eup %4118 }
 0x5d5   : > { %v1674_v20 = vmul.f32 %v4119_v19, %v4111_v59  ;;  %v4039_v19 = vld [vmem:[%s5495_s29 + $0x2c] ss:$16 sps:$4 sm:$0xff]  }
 0x5d7   : > { %v1678_v21 = vpack.c.bf16 %v1674_v20, %v1674_v20  ;;  %v4034_v20 = vld [vmem:[%s5495_s29 + $0x20] ss:$16 sps:$4 sm:$0xff]  }
 0x5d9   : > { %3733 = vmatmul.mubr.msk.bf16.vlgmr.msra.gmra.mrb[24].mxu1 %vm1630_vm3, %v1678_v21 }
 0x5da   : > { %2277 = vmatprep.mubr.bf16.mxu1 %v4802_v5 }
 0x5ee   : > { %v1657_v22 = vpop.xlane.xlu1 %1656 }
 0x5ef   : > { %4120 = vrcp.f32 %v1657_v22 }
 0x5f9   : > { %v4121_v23 = vpop.eup %4120 }
 0x5fa   : > { %v1671_v25 = vmul.f32 %v4121_v23, %v4113_v2 }
 0x5fc   : > { %v1675_v28 = vpack.c.bf16 %v1671_v25, %v1671_v25 }
 0x5fe   : > { %v1663_v29 = vpop.xlane.xlu0 %1662  ;;  %3715 = vmatmul.mubr.msk.bf16.vlgmr.msra.gmra.mrb[4].mxu0 %vm1630_vm3, %v1675_v28 }
 0x5ff   : > { %4122 = vrcp.f32 %v1663_v29  ;;  %3725 = vmatpush3.bf16.msra.mxu0 %v1776_v30  ;;  %3726 = vmatprep.mubr.msk.bf16.mxu0 %vm4804_vm0, %v4803_v6  ;;  %v4042_v30 = vld [vmem:[%s5495_s29 + $0x44] ss:$16 sps:$4 sm:$0xff]  }
 0x600   : > { %3736 = vmatprep.subr.bf16.mxu0 %v4803_v6 }
 0x609   : > { %v4123_v31 = vpop.eup %4122 }
 0x60a   : > { %v1673_v56 = vmul.f32 %v4123_v31, %v4115_v7  ;;  %v3463_v7 = vld [vmem:[%s926_s28] ss:$0 sm:$0xff]  ;;  %v4045_v31 = vld [vmem:[%s5495_s29 + $0x4c] ss:$16 sps:$4 sm:$0xff]  }
 0x60c   : > { %v1677_v32 = vpack.c.bf16 %v1673_v56, %v1673_v56  ;;  %v4040_v56 = vld [vmem:[%s5495_s29 + $0x40] ss:$16 sps:$4 sm:$0xff]  }
 0x60e   : > { %3727 = vmatmul.mubr.msk.bf16.vlgmr.msra.gmra.mrb[8].mxu0 %vm1630_vm3, %v1677_v32  ;;  %v4043_v32 = vld [vmem:[%s5495_s29 + $0x48] ss:$16 sps:$4 sm:$0xff]  }
 0x60f   : > { %3752 = vmatprep.mubr.msk.bf16.mxu0 %vm4804_vm0, %v4803_v6  ;;  %3737 = vmatpush3.bf16.msra.mxu0 %v4020_v35  ;;  %v4048_v35 = vld [vmem:[%s5495_s29 + $0x64] ss:$16 sps:$4 sm:$0xff]  }
 0x610   : > { %3738 = vmatprep.subr.bf16.mxu0 %v4803_v6 }
 0x613   : > { %3739 = vmatpush3.bf16.msra.mxu0 %v4021_v37  ;;  %v4051_v37 = vld [vmem:[%s5495_s29 + $0x6c] ss:$16 sps:$4 sm:$0xff]  }
 0x614   : > { %3740 = vmatprep.subr.bf16.mxu0 %v4803_v6 }
 0x617   : > { %3741 = vmatpush3.bf16.msra.mxu0 %v4022_v38  ;;  %v4046_v38 = vld [vmem:[%s5495_s29 + $0x60] ss:$16 sps:$4 sm:$0xff]  }
 0x618   : > { %3742 = vmatprep.subr.bf16.mxu0 %v4803_v6 }
 0x61b   : > { %3743 = vmatpush3.bf16.msra.mxu0 %v4023_v39  ;;  %v4049_v39 = vld [vmem:[%s5495_s29 + $0x68] ss:$16 sps:$4 sm:$0xff]  }
 0x61c   : > { %3744 = vmatprep.subr.bf16.mxu0 %v4803_v6 }
 0x61f   : > { %3745 = vmatpush3.bf16.msra.mxu0 %v4024_v40  ;;  %v4054_v40 = vld [vmem:[%s5495_s29 + $0x84] ss:$16 sps:$4 sm:$0xff]  }
 0x620   : > { %3746 = vmatprep.subr.bf16.mxu0 %v4803_v6 }
 0x623   : > { %3747 = vmatpush3.bf16.msra.mxu0 %v4025_v41  ;;  %v4057_v41 = vld [vmem:[%s5495_s29 + $0x8c] ss:$16 sps:$4 sm:$0xff]  }
 0x624   : > { %3748 = vmatprep.subr.bf16.mxu0 %v4803_v6 }
 0x627   : > { %3749 = vmatpush3.bf16.msra.mxu0 %v4026_v42  ;;  %v4052_v42 = vld [vmem:[%s5495_s29 + $0x80] ss:$16 sps:$4 sm:$0xff]  }
 0x628   : > { %3750 = vmatprep.subr.bf16.mxu0 %v4803_v6 }
 0x62b   : > { %3751 = vmatpush3.bf16.msra.mxu0 %v4027_v47  ;;  %v4061_v47 = vld [vmem:[%s5495_s29 + $0xa8] ss:$16 sps:$4 sm:$0xff]  }
 0x62c   : > { %2288 = vmatprep.subr.bf16.mxu0 %v4033_v17  ;;  %v4082_v17 = vld [vmem:[%s5505_s8 + $0x8] sm:$0xff]  }
 0x69c   : > { %v1766_v43 = vpop.f32.mrb[20].mxu1 }
 0x69d   : > { %v3722_v44 = vpop.f32.mrb[21].mxu1 }
 0x69e   : > { %v1769_v45 = vpop.f32.mrb[22].mxu1  ;;  %v4060_v44 = vld [vmem:[%s5495_s29 + $0xa4] ss:$16 sps:$4 sm:$0xff]  }
 0x69f   : > { %v3723_v46 = vpop.f32.mrb[23].mxu1  ;;  %v4063_v45 = vld [vmem:[%s5495_s29 + $0xac] ss:$16 sps:$4 sm:$0xff]  }
 0x6a0   : > { %v4058_v46 = vld [vmem:[%s5495_s29 + $0xa0] ss:$16 sps:$4 sm:$0xff]  }
 0x6ac   : > { %v1858_v48 = vpop.f32.mrb[24].mxu1 }
 0x6ad   : > { %v3983_v49 = vpack.i.bf16 %v1858_v48, %v1766_v43  ;;  %v3734_v50 = vpop.f32.mrb[25].mxu1  ;;  %v4055_v43 = vld [vmem:[%s5495_s29 + $0x88] ss:$16 sps:$4 sm:$0xff]   ;;  %v4066_v48 = vld [vmem:[%s5495_s29 + $0xc4] ss:$16 sps:$4 sm:$0xff]  }
 0x6ae   : > { %v1861_v52 = vpop.f32.mrb[26].mxu1  ;;  %v4064_v50 = vld [vmem:[%s5495_s29 + $0xc0] ss:$16 sps:$4 sm:$0xff]  }
 0x6af   : > { %3984 = vrot.lane.b32.xlu1 %v3983_v49, %s4805_s18  ;;  %v3735_v53 = vpop.f32.mrb[27].mxu1  ;;  %v4069_v49 = vld [vmem:[%s5495_s29 + $0xcc] ss:$16 sps:$4 sm:$0xff]   ;;  %v4067_v52 = vld [vmem:[%s5495_s29 + $0xc8] ss:$16 sps:$4 sm:$0xff]  }
 0x6b0   : > { %v4072_v53 = vld [vmem:[%s5495_s29 + $0xe4] ss:$16 sps:$4 sm:$0xff]  }
 0x6d1   : > { %v1720_v54 = vpop.f32.mrb[4].mxu0 }
 0x6d2   : > { %v3716_v55 = vpop.f32.mrb[5].mxu0 }
 0x6d3   : > { %v1723_v57 = vpop.f32.mrb[6].mxu0  ;;  %v4070_v55 = vld [vmem:[%s5495_s29 + $0xe0] ss:$16 sps:$4 sm:$0xff]  }
 0x6d4   : > { %v3717_v59 = vpop.f32.mrb[7].mxu0  ;;  %v4073_v57 = vld [vmem:[%s5495_s29 + $0xe8] ss:$16 sps:$4 sm:$0xff]  }
 0x6e1   : > { %v1812_v60 = vpop.f32.mrb[8].mxu0 }
 0x6e2   : > { %v3728_v6 = vpop.f32.mrb[9].mxu0 }
 0x6e3   : > { %v1815_v61 = vpop.f32.mrb[10].mxu0 }
 0x6e4   : > { %v3729_v62 = vpop.f32.mrb[11].mxu0 }
 0x721   : > { %v3985_v63 = vpop.permute.xlu1 %3984 }
 0x722   : > { %v3987_v0 = vunpack.i.h.bf16 %v3985_v63  ;;  %v3986_v1 = vunpack.i.l.bf16 %v3985_v63 }
 0x724   : > { %v1873_v2 = vsel %vm1445_vm1, %v1812_v60, %v3987_v0  ;;  %v1872_v3 = vsel %vm1445_vm1, %v1720_v54, %v3986_v1  ;;  %v4075_v54 = vld [vmem:[%s5495_s29 + $0xec] ss:$16 sps:$4 sm:$0xff]  }
 0x725   : > { %v1874_v4 = vpack.c.bf16 %v1873_v2, %v1872_v3  ;;  %v3472_v2 = vld [vmem:[%s934_s0] ss:$0 sm:$0xff] }
 0x727   : > { %3753 = vmatmul.mubr.bf16.vlgmr.msra.gmra.mrb[12].mxu0 %v1874_v4 }
 0x728   : > { %2320 = vmatprep.mubr.bf16.mxu0 %v4802_v5  ;;  %v4030_v5 = vld [vmem:[%s5495_s29 + $0x4] ss:$16 sps:$4 sm:$0xff]   ;;  %2289 = vmatpush1.bf16.msra.mxu0 %v4031_v16 }
 0x729   : > { %2245 = vmatprep.subr.bf16.mxu1 %v4030_v5  ;;  %2290 = vmatprep.subr.bf16.mxu0 %v4039_v19  ;;  %v4080_v5 = vld [vmem:[%s5505_s8 + $0x48] sm:$0xff]   ;;  %v4084_v19 = vld [vmem:[%s5505_s8 + $0x50] sm:$0xff]  }
 0x72a   : > { %2246 = vmatpush1.bf16.msra.mxu1 %v4028_v15  ;;  %v4079_v15 = vld [vmem:[%s5505_s8 + $0x80] sm:$0xff]   ;;  %v4081_v16 = vld [vmem:[%s5505_s8 + $0xc8] sm:$0xff]  }
 0x72b   : > { %2247 = vmatprep.subr.bf16.mxu1 %v4036_v18  ;;  %v4083_v18 = vld [vmem:[%s5505_s8 + $0x88] sm:$0xff]  }
 0x72e   : > { %2248 = vmatpush1.bf16.msra.mxu1 %v4034_v20  ;;  %v4085_v20 = vld [vmem:[%s5505_s8 + $0xd0] sm:$0xff]  }
 0x72f   : > { %2249 = vmatprep.subr.bf16.mxu1 %v4042_v30  ;;  %v4095_v30 = vld [vmem:[%s5505_s8 + $0xa0] sm:$0xff]  }
 0x732   : > { %2250 = vmatpush1.bf16.msra.mxu1 %v4040_v56  ;;  %v4097_v56 = vld [vmem:[%s5505_s8 + $0xe8] sm:$0xff]  }
 0x733   : > { %2251 = vmatprep.subr.bf16.mxu1 %v4048_v35  ;;  %v4099_v35 = vld [vmem:[%s5505_s8 + $0xa8] sm:$0xff]  }
 0x736   : > { %2252 = vmatpush1.bf16.msra.mxu1 %v4046_v38  ;;  %v4101_v38 = vld [vmem:[%s5505_s8 + $0xf0] sm:$0xff]  }
 0x737   : > { %2253 = vmatprep.subr.bf16.mxu1 %v4054_v40  ;;  %v4103_v40 = vld [vmem:[%s5505_s8 + $0xb0] sm:$0xff]  }
 0x73a   : > { %2254 = vmatpush1.bf16.msra.mxu1 %v4052_v42  ;;  %v4105_v42 = vld [vmem:[%s5505_s8 + $0xf8] sm:$0xff]  }
 0x73b   : > { %2255 = vmatprep.subr.bf16.mxu1 %v4060_v44  ;;  %v4107_v44 = vld [vmem:[%s5505_s8 + $0xb8] sm:$0xff]  }
 0x73e   : > { %2256 = vmatpush1.bf16.msra.mxu1 %v4058_v46  ;;  %v2079_v46 = vsub.s32 3, %v5571_v33 }
 0x73f   : > { %2257 = vmatprep.subr.bf16.mxu1 %v4066_v48 }
 0x742   : > { %2258 = vmatpush1.bf16.msra.mxu1 %v4064_v50 }
 0x743   : > { %2259 = vmatprep.subr.bf16.mxu1 %v4072_v53 }
 0x746   : > { %2260 = vmatpush1.bf16.msra.mxu1 %v4070_v55 }
 0x7fa   : > { %v1980_v8 = vpop.f32.mrb[12].mxu0 }
 0x7fb   : > { %v1981_v58 = vadd.f32 %v3463_v7, %v1980_v8  ;;  %v3754_v9 = vpop.f32.mrb[13].mxu0  ;;  %v3473_v8 = vld [vmem:[%s942_s3] ss:$0 sm:$0xff] }
 0x7fc   : > { %v1983_v10 = vpop.f32.mrb[14].mxu0 }
 0x7fd   : > { %v1984_v11 = vadd.f32 %v3463_v7, %v1983_v10  ;;  %v3755_v12 = vpop.f32.mrb[15].mxu0  ;;  %v1987_v13 = vadd.f32 %v1981_v58, %v5550_v26  ;;  %v4037_v26 = vld [vmem:[%s5495_s29 + $0x28] ss:$16 sps:$4 sm:$0xff]  }
 0x7fe   : > { %2291 = vmatpush1.bf16.msra.mxu0 %v4037_v26  ;;  %v4076_v12 = vld [vmem:[%s5505_s8 + $0x40] sm:$0xff]   ;;  %v4086_v26 = vld [vmem:[%s5505_s8 + $0x10] sm:$0xff]  }
 0x7ff   : > { %1991 = vadd.xlane.f32.xlu0 %v1987_v13  ;;  %v1988_v14 = vadd.f32 %v1984_v11, %v5552_v27  ;;  %2292 = vmatprep.subr.bf16.mxu0 %v4045_v31  ;;  %v4096_v31 = vld [vmem:[%s5505_s8 + $0x68] sm:$0xff]  }
 0x800   : > { %3606 = vmatprep.subr.bf16.mxu1 %v4076_v12 }
 0x802   : > { %2293 = vmatpush1.bf16.msra.mxu0 %v4043_v32  ;;  %v4098_v32 = vld [vmem:[%s5505_s8 + $0x28] sm:$0xff]  }
 0x803   : > { %1993 = vadd.xlane.f32.xlu0 %v1988_v14  ;;  %2294 = vmatprep.subr.bf16.mxu0 %v4051_v37  ;;  %v4100_v37 = vld [vmem:[%s5505_s8 + $0x70] sm:$0xff]  }
 0x806   : > { %2295 = vmatpush1.bf16.msra.mxu0 %v4049_v39  ;;  %v4102_v39 = vld [vmem:[%s5505_s8 + $0x30] sm:$0xff]  }
 0x807   : > { %2296 = vmatprep.subr.bf16.mxu0 %v4057_v41  ;;  %v4104_v41 = vld [vmem:[%s5505_s8 + $0x78] sm:$0xff]  }
 0x80a   : > { %2297 = vmatpush1.bf16.msra.mxu0 %v4055_v43  ;;  %v4106_v43 = vld [vmem:[%s5505_s8 + $0x38] sm:$0xff]  }
 0x80b   : > { %2298 = vmatprep.subr.bf16.mxu0 %v4063_v45  ;;  %v2063_v45 = vld [vmem:[%s5502_s30] sm:$0xf] }
 0x80c   : > { %v2076_v48 = vrot.slane %v2063_v45, %v1160_v51  ;;  %v2080_v50 = vrot.slane %v2063_v45, %v2079_v46 }
 0x80e   : > { %2299 = vmatpush1.bf16.msra.mxu0 %v4061_v47  ;;  %v2068_v47 = vrot.slane %v2063_v45, %v1152_v36 }
 0x80f   : > { %2300 = vmatprep.subr.bf16.mxu0 %v4069_v49  ;;  %v2072_v49 = vrot.slane %v2063_v45, %v1156_v34 }
 0x812   : > { %2301 = vmatpush1.bf16.msra.mxu0 %v4067_v52 }
 0x813   : > { %2302 = vmatprep.subr.bf16.mxu0 %v4075_v54 }
 0x816   : > { %2303 = vmatpush1.bf16.msra.mxu0 %v4073_v57 }
 0x88c   : > { %v1992_v27 = vpop.xlane.xlu0 %1991 }
 0x88d   : > { %v1996_v21 = vmul.f32 0.0078125, %v1992_v27  ;;  %v4087_v27 = vld [vmem:[%s5505_s8 + $0x90] sm:$0xff]  }
 0x88f   : > { %v5676_v22 = vsub.f32 %v1987_v13, %v1996_v21  ;;  %v4077_v13 = vld [vmem:[%s5505_s8 + $0xc0] sm:$0xff]   ;;  %v4088_v21 = vld [vmem:[%s5505_s8 + $0x58] sm:$0xff]  }
 0x890   : > { %v1994_v23 = vpop.xlane.xlu0 %1993  ;;  %3628 = vmatprep.subr.bf16.mxu0 %v4077_v13 }
 0x891   : > { %v1997_v24 = vmul.f32 0.0078125, %v1994_v23  ;;  %v2000_v25 = vmul.f32 %v5676_v22, %v5676_v22  ;;  %v4090_v23 = vld [vmem:[%s5505_s8 + $0x18] sm:$0xff]  }
 0x893   : > { %v5680_v28 = vsub.f32 %v1988_v14, %v1997_v24  ;;  %2002 = vadd.xlane.f32.xlu0 %v2000_v25  ;;  %v4078_v14 = vld [vmem:[%s5505_s8] sm:$0xff]   ;;  %v4091_v24 = vld [vmem:[%s5505_s8 + $0x98] sm:$0xff]  }
 0x894   : > { %v4092_v25 = vld [vmem:[%s5505_s8 + $0x60] sm:$0xff]  }
 0x895   : > { %v2001_v29 = vmul.f32 %v5680_v28, %v5680_v28 }
 0x897   : > { %2004 = vadd.xlane.f32.xlu0 %v2001_v29  ;;  %v4094_v29 = vld [vmem:[%s5505_s8 + $0x20] sm:$0xff]  }
 0x920   : > { %v2003_v59 = vpop.xlane.xlu0 %2002 }
 0x921   : > { %v2006_v60 = vmul.f32 0.0078125, %v2003_v59 }
 0x923   : > { %v2008_v6 = vadd.f32 1e-12, %v2006_v60 }
 0x924   : > { %v2005_v61 = vpop.xlane.xlu0 %2004 }
 0x925   : > { %4124 = vrsqrt.f32 %v2008_v6  ;;  %v2007_v62 = vmul.f32 0.0078125, %v2005_v61 }
 0x927   : > { %v2009_v63 = vadd.f32 1e-12, %v2007_v62 }
 0x929   : > { %4126 = vrsqrt.f32 %v2009_v63 }
 0x92f   : > { %v4125_v0 = vpop.eup %4124 }
 0x930   : > { %v2012_v1 = vmul.f32 %v4125_v0, %v5676_v22  ;;  %v4089_v22 = vld [vmem:[%s5505_s8 + $0xd8] sm:$0xff]  }
 0x932   : > { %v2020_v7 = vmul.f32 %v3472_v2, %v2012_v1 }
 0x933   : > { %v4127_v3 = vpop.eup %4126 }
 0x934   : > { %v2013_v4 = vmul.f32 %v4127_v3, %v5680_v28  ;;  %v5714_v9 = vadd.f32 %v3473_v8, %v2020_v7  ;;  %v4093_v28 = vld [vmem:[%s5505_s8 + $0xe0] sm:$0xff]  }
 0x936   : > { %v2021_v58 = vmul.f32 %v3472_v2, %v2013_v4 }
 0x938   : > { %v5716_v10 = vadd.f32 %v3473_v8, %v2021_v58 }
 0x93a   : > { %v2030_v11 = vpack.c.bf16 %v5716_v10, %v5714_v9 }
 0x93c   : > { %2278 = vmatmul.mubr.bf16.vlgmr.msra.gmra.mrb[28].mxu1 %v2030_v11  ;;  %2321 = vmatmul.mubr.bf16.vlgmr.msra.gmra.mrb[16].mxu0 %v2030_v11 }
 0x93d   : > { %3607 = vmatpush3.bf16.msra.mxu1 %v4078_v14  ;;  %3629 = vmatpush3.bf16.msra.mxu0 %v4079_v15 }
 0x93e   : > { %3608 = vmatprep.subr.bf16.mxu1 %v4080_v5  ;;  %3630 = vmatprep.subr.bf16.mxu0 %v4081_v16 }
 0x941   : > { %3609 = vmatpush3.bf16.msra.mxu1 %v4082_v17  ;;  %3631 = vmatpush3.bf16.msra.mxu0 %v4083_v18 }
 0x942   : > { %3610 = vmatprep.subr.bf16.mxu1 %v4084_v19  ;;  %3632 = vmatprep.subr.bf16.mxu0 %v4085_v20 }
 0x945   : > { %3611 = vmatpush3.bf16.msra.mxu1 %v4086_v26  ;;  %3633 = vmatpush3.bf16.msra.mxu0 %v4087_v27 }
 0x946   : > { %3612 = vmatprep.subr.bf16.mxu1 %v4088_v21  ;;  %3634 = vmatprep.subr.bf16.mxu0 %v4089_v22 }
 0x949   : > { %3613 = vmatpush3.bf16.msra.mxu1 %v4090_v23  ;;  %3635 = vmatpush3.bf16.msra.mxu0 %v4091_v24 }
 0x94a   : > { %3614 = vmatprep.subr.bf16.mxu1 %v4092_v25  ;;  %3636 = vmatprep.subr.bf16.mxu0 %v4093_v28 }
 0x94d   : > { %3615 = vmatpush3.bf16.msra.mxu1 %v4094_v29  ;;  %3637 = vmatpush3.bf16.msra.mxu0 %v4095_v30 }
 0x94e   : > { %3616 = vmatprep.subr.bf16.mxu1 %v4096_v31  ;;  %3638 = vmatprep.subr.bf16.mxu0 %v4097_v56 }
 0x951   : > { %3617 = vmatpush3.bf16.msra.mxu1 %v4098_v32  ;;  %3639 = vmatpush3.bf16.msra.mxu0 %v4099_v35 }
 0x952   : > { %3618 = vmatprep.subr.bf16.mxu1 %v4100_v37  ;;  %3640 = vmatprep.subr.bf16.mxu0 %v4101_v38 }
 0x955   : > { %3619 = vmatpush3.bf16.msra.mxu1 %v4102_v39  ;;  %3641 = vmatpush3.bf16.msra.mxu0 %v4103_v40 }
 0x956   : > { %3620 = vmatprep.subr.bf16.mxu1 %v4104_v41  ;;  %3642 = vmatprep.subr.bf16.mxu0 %v4105_v42 }
 0x959   : > { %3621 = vmatpush3.bf16.msra.mxu1 %v4106_v43  ;;  %3643 = vmatpush3.bf16.msra.mxu0 %v4107_v44 }
 0xa0f   : > { %v2279_v52 = vpop.f32.mrb[28].mxu1  ;;  %v2322_v53 = vpop.f32.mrb[16].mxu0 }
 0xa10   : > { %v5760_v54 = vadd.f32 %v2279_v52, %v2068_v47  ;;  %v5762_v55 = vadd.f32 %v2322_v53, %v2076_v48  ;;  %v2281_v57 = vpop.f32.mrb[29].mxu1  ;;  %v2324_v59 = vpop.f32.mrb[17].mxu0 }
 0xa11   : > { %v5764_v60 = vadd.f32 %v2281_v57, %v2072_v49  ;;  %v5766_v6 = vadd.f32 %v2324_v59, %v2080_v50  ;;  %v2283_v36 = vpop.f32.mrb[30].mxu1  ;;  %v2326_v61 = vpop.f32.mrb[18].mxu0 }
 0xa12   : > { %v2331_v51 = vmul.f32 %v5760_v54, %v5760_v54  ;;  %v2333_v33 = vmul.f32 %v5762_v55, %v5762_v55  ;;  %v5772_v34 = vadd.f32 %v2283_v36, %v2068_v47  ;;  %v5774_v62 = vadd.f32 %v2326_v61, %v2076_v48  ;;  %v2285_v63 = vpop.f32.mrb[31].mxu1  ;;  %v2328_v0 = vpop.f32.mrb[19].mxu0 }
 0xa13   : > { %v2332_v1 = vmul.f32 %v5764_v60, %v5764_v60  ;;  %v2334_v2 = vmul.f32 %v5766_v6, %v5766_v6  ;;  %v5780_v3 = vadd.f32 %v2285_v63, %v2072_v49  ;;  %v5782_v4 = vadd.f32 %v2328_v0, %v2080_v50 }
 0xa14   : > { %v2339_v7 = vmul.f32 %v2331_v51, %v5760_v54  ;;  %v2341_v8 = vmul.f32 %v2333_v33, %v5762_v55  ;;  %v2335_v58 = vmul.f32 %v5772_v34, %v5772_v34  ;;  %v2337_v11 = vmul.f32 %v5774_v62, %v5774_v62 }
 0xa15   : > { %v2340_v12 = vmul.f32 %v2332_v1, %v5764_v60  ;;  %v2342_v13 = vmul.f32 %v2334_v2, %v5766_v6  ;;  %v2336_v14 = vmul.f32 %v5780_v3, %v5780_v3  ;;  %v2338_v15 = vmul.f32 %v5782_v4, %v5782_v4 }
 0xa16   : > { %v2347_v5 = vmul.f32 0.044715, %v2339_v7  ;;  %v2349_v16 = vmul.f32 0.044715, %v2341_v8  ;;  %v2343_v17 = vmul.f32 %v2335_v58, %v5772_v34  ;;  %v2345_v18 = vmul.f32 %v2337_v11, %v5774_v62 }
 0xa17   : > { %v2348_v19 = vmul.f32 0.044715, %v2340_v12  ;;  %v2350_v20 = vmul.f32 0.044715, %v2342_v13  ;;  %v2344_v26 = vmul.f32 %v2336_v14, %v5780_v3  ;;  %v2346_v27 = vmul.f32 %v2338_v15, %v5782_v4 }
 0xa18   : > { %v2355_v21 = vadd.f32 %v2347_v5, %v5760_v54  ;;  %v2357_v22 = vadd.f32 %v2349_v16, %v5762_v55  ;;  %v2351_v23 = vmul.f32 0.044715, %v2343_v17  ;;  %v2353_v24 = vmul.f32 0.044715, %v2345_v18 }
 0xa19   : > { %v2356_v25 = vadd.f32 %v2348_v19, %v5764_v60  ;;  %v2358_v28 = vadd.f32 %v2350_v20, %v5766_v6  ;;  %v2352_v29 = vmul.f32 0.044715, %v2344_v26  ;;  %v2354_v30 = vmul.f32 0.044715, %v2346_v27 }
 0xa1a   : > { %v2363_v31 = vmul.f32 0.7978846, %v2355_v21  ;;  %v2365_v56 = vmul.f32 0.7978846, %v2357_v22  ;;  %v2359_v32 = vadd.f32 %v2351_v23, %v5772_v34  ;;  %v2361_v35 = vadd.f32 %v2353_v24, %v5774_v62 }
 0xa1b   : > { %v2364_v37 = vmul.f32 0.7978846, %v2356_v25  ;;  %v2366_v38 = vmul.f32 0.7978846, %v2358_v28  ;;  %v2360_v39 = vadd.f32 %v2352_v29, %v5780_v3  ;;  %v2362_v40 = vadd.f32 %v2354_v30, %v5782_v4 }
 0xa1c   : > { %4128 = vtanh.f32 %v2363_v31  ;;  %v2367_v41 = vmul.f32 0.7978846, %v2359_v32  ;;  %v2369_v42 = vmul.f32 0.7978846, %v2361_v35 }
 0xa1d   : > { %4130 = vtanh.f32 %v2365_v56  ;;  %v2368_v43 = vmul.f32 0.7978846, %v2360_v39  ;;  %v2370_v44 = vmul.f32 0.7978846, %v2362_v40 }
 0xa1e   : > { %4132 = vtanh.f32 %v2364_v37 }
 0xa1f   : > { %4134 = vtanh.f32 %v2366_v38 }
 0xa20   : > { %4136 = vtanh.f32 %v2367_v41 }
 0xa21   : > { %4138 = vtanh.f32 %v2369_v42 }
 0xa22   : > { %4140 = vtanh.f32 %v2368_v43 }
 0xa23   : > { %4142 = vtanh.f32 %v2370_v44 }
 0xa26   : > { %v4129_v45 = vpop.eup %4128 }
 0xa27   : > { %v4131_v46 = vpop.eup %4130  ;;  %v2379_v47 = vadd.f32 1.0, %v4129_v45 }
 0xa28   : > { %v4133_v48 = vpop.eup %4132  ;;  %v2381_v49 = vadd.f32 1.0, %v4131_v46 }
 0xa29   : > { %v4135_v50 = vpop.eup %4134  ;;  %v2380_v52 = vadd.f32 1.0, %v4133_v48  ;;  %v2387_v36 = vmul.f32 0.5, %v2379_v47 }
 0xa2a   : > { %v4137_v53 = vpop.eup %4136  ;;  %v2382_v57 = vadd.f32 1.0, %v4135_v50  ;;  %v2389_v33 = vmul.f32 0.5, %v2381_v49 }
 0xa2b   : > { %v4139_v59 = vpop.eup %4138  ;;  %v2383_v61 = vadd.f32 1.0, %v4137_v53  ;;  %v2388_v7 = vmul.f32 0.5, %v2380_v52  ;;  %v2395_v12 = vmul.f32 %v2387_v36, %v5760_v54  ;;  %v3539_v52 = vld [vmem:[%s985_s20] ss:$0 sm:$0xff] }
 0xa2c   : > { %v4141_v51 = vpop.eup %4140  ;;  %v2385_v63 = vadd.f32 1.0, %v4139_v59  ;;  %v2390_v11 = vmul.f32 0.5, %v2382_v57  ;;  %v2397_v15 = vmul.f32 %v2389_v33, %v5762_v55  ;;  %v3540_v57 = vld [vmem:[%s993_s21] ss:$0 sm:$0xff] }
 0xa2d   : > { %v4143_v0 = vpop.eup %4142  ;;  %v2391_v1 = vmul.f32 0.5, %v2383_v61  ;;  %v2384_v2 = vadd.f32 1.0, %v4141_v51  ;;  %v2396_v17 = vmul.f32 %v2388_v7, %v5764_v60  ;;  %v4150_v7 = vld [vmem:[#allocation27 + $0x10] sm:$0xff] (!%p3541_p3)  }
 0xa2e   : > { %v2393_v8 = vmul.f32 0.5, %v2385_v63  ;;  %v2386_v58 = vadd.f32 1.0, %v4143_v0  ;;  %v2398_v20 = vmul.f32 %v2390_v11, %v5766_v6  ;;  %v4148_v0 = vld [vmem:[#allocation27] sm:$0xff] (!%p3541_p3)  }
 0xa2f   : > { %v2399_v13 = vmul.f32 %v2391_v1, %v5772_v34  ;;  %v2392_v14 = vmul.f32 0.5, %v2384_v2  ;;  %v4806_v1 = vmov (!%p3541_p3), 0.0   ;;  %v4149_v2 = vld [vmem:[#allocation27 + $0x8] sm:$0xff] (!%p3541_p3)   ;;  %v2802_v11 = vld [vmem:[#allocation8] sm:$0x3] (!%p3541_p3) }
 0xa30   : > { %v2401_v5 = vmul.f32 %v2393_v8, %v5774_v62  ;;  %v2394_v16 = vmul.f32 0.5, %v2386_v58  ;;  %v3506_v62 = vld [vmem:[%s977_s10] ss:$0 sm:$0xff]  ;;  %3756 = vmatprep.subr.bf16.mxu0 (!%p3541_p3), %v4806_v1  ;;  %3776 = vmatprep.subr.bf16.mxu1 (!%p3541_p3), %v4806_v1  ;;  %v4151_v8 = vld [vmem:[#allocation27 + $0x18] sm:$0xff] (!%p3541_p3)  }
 0xa31   : > { %v2400_v18 = vmul.f32 %v2392_v14, %v5780_v3  ;;  %v2403_v19 = vpack.c.bf16 %v2399_v13, %v2395_v12  ;;  %v2804_v12 = vrot.slane (!%p3541_p3), %v2802_v11, 1  ;;  %v4156_v13 = vld [vmem:[%s6039_s23] sm:$0xff] (!%p3541_p3)  }
 0xa32   : > { %v2402_v26 = vmul.f32 %v2394_v16, %v5782_v4  ;;  %v2405_v27 = vpack.c.bf16 %v2401_v5, %v2397_v15  ;;  %v4157_v5 = vld [vmem:[%s6039_s23 + $0x8] sm:$0xff] (!%p3541_p3)   ;;  %v4152_v16 = vld [vmem:[#allocation27 + $0x20] sm:$0xff] (!%p3541_p3)  }
 0xa33   : > { %v2404_v54 = vpack.c.bf16 %v2400_v18, %v2396_v17 }
 0xa34   : > { %v2406_v21 = vpack.c.bf16 %v2402_v26, %v2398_v20  ;;  %v4153_v20 = vld [vmem:[#allocation27 + $0x28] sm:$0xff] (!%p3541_p3)  }
 0xa35   : > { %2702 = vmatprep.mubr.bf16.mxu1 %v2404_v54  ;;  %v4159_v54 = vld [vmem:[%s6039_s23 + $0x18] sm:$0xff] (!%p3541_p3)  }
 0xa36   : > { %2743 = vmatprep.mubr.bf16.mxu0 %v2406_v21  ;;  %2703 = vmatmul.mubr.bf16.vlgmr.msra.gmra.mrb[32].mxu1 %v2403_v19  ;;  %v4158_v19 = vld [vmem:[%s6039_s23 + $0x10] sm:$0xff] (!%p3541_p3)   ;;  %v4154_v21 = vld [vmem:[#allocation27 + $0x30] sm:$0xff] (!%p3541_p3)  }
 0xa37   : > { %2744 = vmatmul.mubr.bf16.vlgmr.msra.gmra.mrb[20].mxu0 %v2405_v27  ;;  %3792 = vmatprep.mubr.msk.bf16.mxu1 (!%p3541_p3), %vm4807_vm4, %v4806_v1 }
 0xa38   : > { %3757 = vmatpush3.bf16.msra.mxu0 (!%p3541_p3), %v4148_v0  ;;  %3772 = vmatprep.mubr.msk.bf16.mxu0 (!%p3541_p3), %vm4807_vm4, %v4806_v1 }
 0xa39   : > { %3758 = vmatprep.subr.bf16.mxu0 (!%p3541_p3), %v4806_v1  ;;  %3777 = vmatpush3.bf16.msra.mxu1 (!%p3541_p3), %v4156_v13 }
 0xa3a   : > { %3778 = vmatprep.subr.bf16.mxu1 (!%p3541_p3), %v4806_v1 }
 0xa3c   : > { %3759 = vmatpush3.bf16.msra.mxu0 (!%p3541_p3), %v4149_v2 }
 0xa3d   : > { %3760 = vmatprep.subr.bf16.mxu0 (!%p3541_p3), %v4806_v1  ;;  %3779 = vmatpush3.bf16.msra.mxu1 (!%p3541_p3), %v4157_v5 }
 0xa3e   : > { %3780 = vmatprep.subr.bf16.mxu1 (!%p3541_p3), %v4806_v1 }
 0xa40   : > { %3761 = vmatpush3.bf16.msra.mxu0 (!%p3541_p3), %v4150_v7 }
 0xa41   : > { %3762 = vmatprep.subr.bf16.mxu0 (!%p3541_p3), %v4806_v1  ;;  %3781 = vmatpush3.bf16.msra.mxu1 (!%p3541_p3), %v4158_v19 }
 0xa42   : > { %3782 = vmatprep.subr.bf16.mxu1 (!%p3541_p3), %v4806_v1 }
 0xa44   : > { %3763 = vmatpush3.bf16.msra.mxu0 (!%p3541_p3), %v4151_v8 }
 0xa45   : > { %3764 = vmatprep.subr.bf16.mxu0 (!%p3541_p3), %v4806_v1  ;;  %3783 = vmatpush3.bf16.msra.mxu1 (!%p3541_p3), %v4159_v54 }
 0xa46   : > { %3784 = vmatprep.subr.bf16.mxu1 (!%p3541_p3), %v4806_v1 }
 0xa48   : > { %3765 = vmatpush3.bf16.msra.mxu0 (!%p3541_p3), %v4152_v16 }
 0xa49   : > { %3766 = vmatprep.subr.bf16.mxu0 (!%p3541_p3), %v4806_v1 }
 0xa4c   : > { %3767 = vmatpush3.bf16.msra.mxu0 (!%p3541_p3), %v4153_v20 }
 0xa4d   : > { %3768 = vmatprep.subr.bf16.mxu0 (!%p3541_p3), %v4806_v1 }
 0xa50   : > { %3769 = vmatpush3.bf16.msra.mxu0 (!%p3541_p3), %v4154_v21 }
 0xa51   : > { %3770 = vmatprep.subr.bf16.mxu0 (!%p3541_p3), %v4806_v1 }
 0xb09   : > { %v3622_v55 = vpop.f32.mrb[32].mxu1 }
 0xb0a   : > { %v3644_v34 = vpop.f32.mrb[20].mxu0  ;;  %v3623_v22 = vpop.f32.mrb[33].mxu1 }
 0xb0b   : > { %v3624_v60 = vadd.f32 %v3623_v22, %v3622_v55  ;;  %v3645_v23 = vpop.f32.mrb[21].mxu0  ;;  %v3625_v3 = vpop.f32.mrb[34].mxu1  ;;  %v4155_v22 = vld [vmem:[#allocation27 + $0x38] sm:$0xff] (!%p3541_p3)  }
 0xb0c   : > { %v3646_v24 = vadd.f32 %v3645_v23, %v3644_v34  ;;  %v3647_v25 = vpop.f32.mrb[22].mxu0  ;;  %v3626_v6 = vpop.f32.mrb[35].mxu1  ;;  %v4161_v23 = vld [vmem:[%s6039_s23 + $0x28] sm:$0xff] (!%p3541_p3)   ;;  %3771 = vmatpush3.bf16.msra.mxu0 (!%p3541_p3), %v4155_v22 }
 0xb0d   : > { %v2705_v28 = vadd.f32 %v3624_v60, %v3506_v62  ;;  %v3627_v4 = vadd.f32 %v3626_v6, %v3625_v3  ;;  %v3648_v29 = vpop.f32.mrb[23].mxu0  ;;  %v3542_v6 = vld [vmem:[#allocation29] ss:$0 sm:$0xff] (!%p3541_p3) }
 0xb0e   : > { %v3649_v30 = vadd.f32 %v3648_v29, %v3647_v25  ;;  %v4163_v25 = vld [vmem:[%s6039_s23 + $0x38] sm:$0xff] (!%p3541_p3)  }
 0xb0f   : > { %v2746_v31 = vadd.f32 %v3646_v24, %v2705_v28  ;;  %v2708_v56 = vadd.f32 %v3627_v4, %v3506_v62  ;;  %v4160_v62 = vld [vmem:[%s6039_s23 + $0x20] sm:$0xff] (!%p3541_p3)   ;;  %v4162_v24 = vld [vmem:[%s6039_s23 + $0x30] sm:$0xff] (!%p3541_p3)  }
 0xb10   : > { %3785 = vmatpush3.bf16.msra.mxu1 (!%p3541_p3), %v4160_v62 }
 0xb11   : > { %v2749_v32 = vadd.f32 %v3649_v30, %v2708_v56  ;;  %v2752_v35 = vadd.f32 %v2746_v31, %v5714_v9  ;;  %3786 = vmatprep.subr.bf16.mxu1 (!%p3541_p3), %v4806_v1 }
 0xb13   : > { %2756 = vadd.xlane.f32.xlu1 %v2752_v35  ;;  %v2753_v37 = vadd.f32 %v2749_v32, %v5716_v10 }
 0xb14   : > { %3787 = vmatpush3.bf16.msra.mxu1 (!%p3541_p3), %v4161_v23 }
 0xb15   : > { %2758 = vadd.xlane.f32.xlu0 %v2753_v37  ;;  %3788 = vmatprep.subr.bf16.mxu1 (!%p3541_p3), %v4806_v1 }
 0xb18   : > { %3789 = vmatpush3.bf16.msra.mxu1 (!%p3541_p3), %v4162_v24 }
 0xb19   : > { %3790 = vmatprep.subr.bf16.mxu1 (!%p3541_p3), %v4806_v1 }
 0xb1c   : > { %3791 = vmatpush3.bf16.msra.mxu1 (!%p3541_p3), %v4163_v25 }
 0xba0   : > { %v2757_v38 = vpop.xlane.xlu1 %2756 }
 0xba1   : > { %v2760_v39 = vmul.f32 0.0078125, %v2757_v38 }
 0xba2   : > { %v2759_v40 = vpop.xlane.xlu0 %2758 }
 0xba3   : > { %v2762_v41 = vsub.f32 %v2752_v35, %v2760_v39  ;;  %v2761_v42 = vmul.f32 0.0078125, %v2759_v40  ;;  %v3551_v35 = vld [vmem:[%s6040_s4] ss:$0 sm:$0xff] (!%p3541_p3) }
 0xba5   : > { %v2763_v43 = vsub.f32 %v2753_v37, %v2761_v42  ;;  %v2764_v44 = vmul.f32 %v2762_v41, %v2762_v41 }
 0xba7   : > { %2766 = vadd.xlane.f32.xlu0 %v2764_v44  ;;  %v2765_v45 = vmul.f32 %v2763_v43, %v2763_v43 }
 0xbab   : > { %2768 = vadd.xlane.f32.xlu0 %v2765_v45 }
 0xc34   : > { %v2767_v46 = vpop.xlane.xlu0 %2766 }
 0xc35   : > { %v2770_v47 = vmul.f32 0.0078125, %v2767_v46 }
 0xc37   : > { %v2772_v48 = vadd.f32 1e-12, %v2770_v47 }
 0xc38   : > { %v2769_v9 = vpop.xlane.xlu0 %2768 }
 0xc39   : > { %4144 = vrsqrt.f32 %v2772_v48  ;;  %v2771_v49 = vmul.f32 0.0078125, %v2769_v9 }
 0xc3b   : > { %v2773_v10 = vadd.f32 1e-12, %v2771_v49 }
 0xc3d   : > { %4146 = vrsqrt.f32 %v2773_v10 }
 0xc43   : > { %v4145_v50 = vpop.eup %4144 }
 0xc44   : > { %v2776_v53 = vmul.f32 %v4145_v50, %v2762_v41 }
 0xc46   : > { %v2784_v59 = vmul.f32 %v3539_v52, %v2776_v53 }
 0xc47   : > { %v4147_v36 = vpop.eup %4146 }
 0xc48   : > { %v2792_v61 = vadd.f32 %v3540_v57, %v2784_v59  ;;  %v2777_v51 = vmul.f32 %v4147_v36, %v2763_v43  ;;  %2799 = sbr.rel (%p3541_p3) target bundleno = 3602 (0xe12), region = 172 }
 0xc4a   : > { %2794 = vst [vmem:[#allocation2] sm:$0xff] %v2792_v61  ;;  %v2785_v33 = vmul.f32 %v3539_v52, %v2777_v51 }
 0xc4c   : > { %v2793_v63 = vadd.f32 %v3540_v57, %v2785_v33 }
 0xc4e   : > { %2795 = vst [vmem:[#allocation2 + $0x8] sm:$0xff] %v2793_v63 }
 0xc51   : > { %v2800_v14 = vld [vmem:[#allocation2] sm:$0x1] }
 0xc52   : > { %v2807_v17 = vmul.f32 %v2802_v11, %v2800_v14 }
 0xc54   : > { %v2809_v26 = vpack.c.bf16 %v2807_v17, %v2807_v17 }
 0xc55   : > { %v2801_v58 = vld [vmem:[#allocation2 + $0x8] sm:$0x1] }
 0xc56   : > { %v2808_v15 = vmul.f32 %v2804_v12, %v2801_v58  ;;  %v2836_v55 = vunpack.c.l.b16 %v2809_v26 }
 0xc58   : > { %v2810_v18 = vpack.c.bf16 %v2808_v15, %v2808_v15 }
 0xc5a   : > { %v2837_v27 = vunpack.c.l.b16 %v2810_v18 }
 0xc5c   : > { %v2838_v34 = vrot.slane %v2837_v27, 7 }
 0xc5e   : > { %v2840_v60 = vsel %vm2839_vm5, %v2838_v34, %v2836_v55 }
 0xc5f   : > { %v2841_v3 = vpack.c.b16 %v2840_v60, %v2840_v60 }
 0xc61   : > { %3773 = vmatmul.mubr.bf16.vlgmr.msra.gmra.mrb[0].mxu0 %v2841_v3 }
 0xd34   : > { %v2925_v28 = vpop.f32.mrb[0].mxu0 }
 0xd35   : > { %v2926_v4 = vadd.f32 %v3542_v6, %v2925_v28  ;;  %v3774_v29 = vpop.f32.mrb[1].mxu0 }
 0xd36   : > { %v2928_v30 = vpop.f32.mrb[2].mxu0 }
 0xd37   : > { %v2931_v31 = vmax.f32 %v2926_v4, 0.0  ;;  %v3775_v56 = vpop.f32.mrb[3].mxu0 }
 0xd39   : > { %v2932_v32 = vpack.c.bf16 %v2931_v31, %v2931_v31 }
 0xd3b   : > { %3793 = vmatmul.mubr.bf16.vlgmr.msra.gmra.mrb[0].mxu1 %v2932_v32 }
 0xe0e   : > { %v3038_v37 = vpop.f32.mrb[0].mxu1 }
 0xe0f   : > { %v3039_v38 = vadd.f32 %v3551_v35, %v3038_v37  ;;  %v3794_v39 = vpop.f32.mrb[1].mxu1 }
 0xe10   : > { %v3041_v40 = vpop.f32.mrb[2].mxu1 }
 0xe11   : > { %3044 = vst [vmem:[#allocation30] sm:$0x3] %v3039_v38  ;;  %v3795_v41 = vpop.f32.mrb[3].mxu1 }
 0xe12 PF: > { %s6041_s12 = sld [smem:[#allocation44_spill]]  ;;  %s4808_s17 = smov [#allocation30]  }
 0xe13   : > { %s3054_s2 = sshll.u32 %s4808_s17, 4  ;;  %s3055_s2 = int_to_ptr.vmem [resolvable:$true] %s3054_s2 }
 0xe14   : > { %s4664_s28 = scalar_lea.vmem %s3055_s2, 32  ;;  %p4671_p7 = scmp.lt.s32.totalorder %s3055_s2, %s3055_s2 }
 0xe15   : > { %p4665_p13 = scmp.ne.s32.totalorder %s3055_s2, %s4664_s28  ;;  %p4672_p8 = scmp.lt.s32.totalorder %s4664_s28, %s4664_s28 }
 0xe17   : > { %p4673_p0 = por %p4672_p8, %p4671_p7 }
 0xe18   : > { %p3914_p4 = scmp.eq.s32.totalorder %s6041_s12, 1 }
 0xe1a   : > { %p4666_p1 = pnand %p4665_p13, %p3914_p4 }
 0xe1c   : > { %p4667_p12 = pneg %p4666_p1 }
 0xe1e   : > { %p4674_p11 = pnand %p4673_p0, %p4667_p12 }
 0xe20   : > { %4677 = shalt.err (!%p4674_p11)
}
 0xe21   : > { %s6042_s29 = sld [smem:[#allocation64_spill]] }
 0xe27   : > { %s4678_s30 = scalar_lea.hbm %s6042_s29, 32 }
 0xe28   : > { %p4679_p5 = scmp.ne.s32.totalorder %s6042_s29, %s4678_s30  ;;  %p4684_p2 = scmp.lt.u32.totalorder %s4678_s30, %s6042_s29 }
 0xe2a   : > { %p4680_p9 = pnand %p4679_p5, %p3914_p4 }
 0xe2c   : > { %p4681_p10 = pneg %p4680_p9 }
 0xe2e   : > { %p4686_p6 = pnand %p4684_p2, %p4681_p10 }
 0xe30   : > { %4689 = shalt.err (!%p4686_p6)
}
 0xe31   : > { %3847 = dma.vmem_to_hbm [thread:$0]  (%p3914_p4), %s3055_s2, 32, %s6042_s29, [#allocation5]  }
 0xe32   : > { %4751 = dma.done.wait (%p3914_p4), [#allocation5], 32  }
 0xe33   : > { %4753 = vsyncadd (%p3914_p4), [#allocation5], 4294967264 }
 0xe34 PF: > { %s51_s22 = sadd.s32 1, %s4776_s22   ;;  %s6043_s0 = sld [smem:[#allocation41_spill]] }
 0xe35   : > { %p48_p3 = scmp.ge.s32.totalorder %s51_s22, 4   ;;  %s6044_s30 = sld [smem:[#allocation42_spill]] }
 0xe36   : > { %s6045_s20 = sld [smem:[#allocation48_spill]]  ;;  %s6046_s9 = sld [smem:[#allocation47_spill]] }
 0xe37   : > { %s6047_s21 = smov %s4772_s1  ;;  %50 = sbr.rel (!%p48_p3) target bundleno = 35 (0x23), region = 297 }
 0xe3c   : > { %s6048_s1 = smov %s6046_s9 }
 0xe3e   :  { %3067 = vsyncpa [#allocation4], 1 }
 0xe3f   :  { %3069 = vsyncpa [#allocation4 + $0x1], 1 }
 0xe40   :  { %3070 = vsyncpa [#allocation7], 1 }
 0xe41   :  { %3071 = vsyncpa [#allocation10], 1 }
 0xe42   :  { %3073 = vsyncpa [#allocation10 + $0x1], 1 }
 0xe43   :  { %3074 = vsyncpa [#allocation13], 1 }
 0xe44   :  { %3076 = vsyncpa [#allocation13 + $0x1], 1 }
 0xe45   :  { %3077 = vsyncpa [#allocation16], 1 }
 0xe46   :  { %3079 = vsyncpa [#allocation16 + $0x1], 1 }
 0xe47   :  { %3080 = vsyncpa [#allocation19], 1 }
 0xe48   :  { %3082 = vsyncpa [#allocation19 + $0x1], 1 }
 0xe49   :  { %3083 = vsyncpa [#allocation22], 1 }
 0xe4a   :  { %3085 = vsyncpa [#allocation22 + $0x1], 1 }
 0xe4b   :  { %3086 = vsyncpa [#allocation25], 1 }
 0xe4c   :  { %3088 = vsyncpa [#allocation25 + $0x1], 1 }
 0xe4d   :  { %3089 = vsyncpa [#allocation28], 1 }
 0xe4e   :  { %3090 = vsyncpa [#allocation5], 1 }
 0xe4f   :  { %3092 = vsyncpa [#allocation5 + $0x1], 1 }

</bundles_post_ra>
